<compile_context>
chip_gen: v7x
topology: tpu7x:2x2x1
jax: 0.10.0
libtpu: 0.0.40
codegen_flags: <defaults>
</compile_context>

<pallas_src>
import functools

import jax
import jax.numpy as jnp
from jax import lax
from jax.experimental import pallas as pl
from jax.experimental.pallas import tpu as pltpu


C_PAD = 128  # lane-dense channel / output padding


def _round_up(x, m):
    return (x + m - 1) // m * m


def _choose_tile(dim, candidates=(512, 256, 128)):
    for c in candidates:
        if dim % c == 0:
            return c
    return candidates[-1]


# ----------------------------------------------------------------------------
# Pallas kernel: tiled matmul + bias + activation ("mish" | "relu" | "none")
# ----------------------------------------------------------------------------
def _matmul_bias_act_kernel(act, a_ref, b_ref, bias_ref, o_ref, acc_ref):
    k = pl.program_id(2)

    @pl.when(k == 0)
    def _init():
        acc_ref[...] = jnp.zeros_like(acc_ref)

    acc_ref[...] += jnp.dot(a_ref[...], b_ref[...],
                            preferred_element_type=jnp.float32)

    @pl.when(k == pl.num_programs(2) - 1)
    def _epilogue():
        acc = acc_ref[...] + bias_ref[...]          # (TM,TN) + (1,TN), f32
        if act == "mish":
            # mish(x) = x * tanh(softplus(x)) = x * t / (t + 2), t = e^x(e^x+2)
            e = jnp.exp(jnp.minimum(acc, 20.0))
            t = e * (e + 2.0)
            acc = jnp.where(acc > 20.0, acc, acc * (t / (t + 2.0)))
        elif act == "relu":
            acc = jnp.maximum(acc, 0.0)
        o_ref[...] = acc.astype(o_ref.dtype)


def matmul_bias_act(a, b, bias, act, out_dtype=jnp.float32):
    """a: (M,K), b: (K,N), bias: (N,) or (1,N) -> (M, round_up(N,128))."""
    M, K = a.shape
    K2, N = b.shape
    assert K == K2, (a.shape, b.shape)

    TM = min(256, _round_up(M, 32))
    Mpad = _round_up(M, TM)
    Npad = _round_up(N, 128)
    TN = _choose_tile(Npad)
    Kpad = _round_up(K, 128)
    TK = _choose_tile(Kpad)

    if Mpad != M or Kpad != K:
        a = jnp.pad(a, ((0, Mpad - M), (0, Kpad - K)))
    if Kpad != K or Npad != N:
        b = jnp.pad(b, ((0, Kpad - K), (0, Npad - N)))
    bias2d = jnp.asarray(bias, jnp.float32).reshape(1, -1)
    if bias2d.shape[1] != Npad:
        bias2d = jnp.pad(bias2d, ((0, 0), (0, Npad - bias2d.shape[1])))

    a = a.astype(jnp.bfloat16)   # feed the MXU bf16, accumulate f32
    b = b.astype(jnp.bfloat16)

    out = pl.pallas_call(
        functools.partial(_matmul_bias_act_kernel, act),
        out_shape=jax.ShapeDtypeStruct((Mpad, Npad), out_dtype),
        grid=(Mpad // TM, Npad // TN, Kpad // TK),
        in_specs=[
            pl.BlockSpec((TM, TK), lambda i, j, k: (i, k)),
            pl.BlockSpec((TK, TN), lambda i, j, k: (k, j)),
            pl.BlockSpec((1, TN), lambda i, j, k: (0, j)),
        ],
        out_specs=pl.BlockSpec((TM, TN), lambda i, j, k: (i, j)),
        scratch_shapes=[pltpu.VMEM((TM, TN), jnp.float32)],
        compiler_params=pltpu.CompilerParams(
            dimension_semantics=("parallel", "parallel", "arbitrary")),
    )(a, b, bias2d)
    if Mpad != M:
        out = out[:M]
    return out


# ----------------------------------------------------------------------------
# Pallas kernel: fused FC head  relu(x @ w1 + b1) @ w2 + b2
# ----------------------------------------------------------------------------
def _fc_head_kernel(x_ref, w1_ref, b1_ref, w2_ref, b2_ref, o_ref):
    h = jnp.dot(x_ref[...], w1_ref[...], preferred_element_type=jnp.float32)
    h = jnp.maximum(h + b1_ref[...], 0.0)
    out = jnp.dot(h.astype(jnp.bfloat16), w2_ref[...],
                  preferred_element_type=jnp.float32)
    o_ref[...] = (out + b2_ref[...]).astype(o_ref.dtype)


def fc_head(flat, w1, b1, w2, b2, n_actions):
    M, K1 = flat.shape
    H1 = w1.shape[1]
    N2 = w2.shape[1]                       # already padded to 128
    TM = min(256, _round_up(M, 32))
    Mpad = _round_up(M, TM)
    if Mpad != M:
        flat = jnp.pad(flat, ((0, Mpad - M), (0, 0)))
    flat = flat.astype(jnp.bfloat16)

    out = pl.pallas_call(
        _fc_head_kernel,
        out_shape=jax.ShapeDtypeStruct((Mpad, N2), jnp.float32),
        grid=(Mpad // TM,),
        in_specs=[
            pl.BlockSpec((TM, K1), lambda i: (i, 0)),
            pl.BlockSpec((K1, H1), lambda i: (0, 0)),
            pl.BlockSpec((1, H1), lambda i: (0, 0)),
            pl.BlockSpec((H1, N2), lambda i: (0, 0)),
            pl.BlockSpec((1, N2), lambda i: (0, 0)),
        ],
        out_specs=pl.BlockSpec((TM, N2), lambda i: (i, 0)),
        compiler_params=pltpu.CompilerParams(
            dimension_semantics=("parallel",)),
    )(flat, w1, b1, w2, b2)
    return out[:M, :n_actions]


# ----------------------------------------------------------------------------
# Conv2d (VALID, stride s): im2col glue + Pallas matmul kernel (hot path)
# ----------------------------------------------------------------------------
def conv2d_act(x_nhwc, wmat, bias, kh, kw, stride, act):
    n, h, w, c = x_nhwc.shape
    oh = (h - kh) // stride + 1
    ow = (w - kw) // stride + 1
    cols = []
    for i in range(kh):
        for j in range(kw):
            cols.append(x_nhwc[:, i:i + stride * (oh - 1) + 1:stride,
                                  j:j + stride * (ow - 1) + 1:stride, :])
    patches = jnp.stack(cols, axis=3).reshape(n * oh * ow, kh * kw * c)
    out = matmul_bias_act(patches, wmat, bias, act, out_dtype=jnp.bfloat16)
    return out.reshape(n, oh, ow, -1)      # channels padded to 128


# ----------------------------------------------------------------------------
# Parameters: raw (PyTorch-equivalent) init + kernel-ready preparation
# ----------------------------------------------------------------------------
def _conv_out_hw(h, w):
    oh, ow = (h - 8) // 4 + 1, (w - 8) // 4 + 1
    oh, ow = (oh - 4) // 2 + 1, (ow - 4) // 2 + 1
    oh, ow = oh - 3 + 1, ow - 3 + 1
    return oh, ow


def init_dqn_params(key, in_channels, h, w, n_actions):
    def nrm(k, shape, scale=0.05):
        return jax.random.normal(k, shape, dtype=jnp.float32) * scale

    ks = jax.random.split(key, 10)
    oh, ow = _conv_out_hw(h, w)
    conv_out_size = 64 * oh * ow
    return {
        "w1": nrm(ks[0], (8, 8, in_channels, 32)), "b1": nrm(ks[1], (32,)),
        "w2": nrm(ks[2], (4, 4, 32, 64)),          "b2": nrm(ks[3], (64,)),
        "w3": nrm(ks[4], (3, 3, 64, 64)),          "b3": nrm(ks[5], (64,)),
        "fc_w1": nrm(ks[6], (conv_out_size, 512)), "fc_b1": nrm(ks[7], (512,)),
        "fc_w2": nrm(ks[8], (512, n_actions)),     "fc_b2": nrm(ks[9], (n_actions,)),
    }


def prepare_params(params, in_channels, h, w, n_actions):
    """One-time weight prep: fold /256 into w1, pad Cin/Cout to 128, permute
    fc_w1 rows to NHWC-with-padded-channels flatten order, cast to bf16."""
    def pad_last(x):
        n = x.shape[-1]
        npad = _round_up(n, 128)
        if npad != n:
            x = jnp.pad(x, [(0, 0)] * (x.ndim - 1) + [(0, npad - n)])
        return x

    def conv_wmat(w_hwio, cin_pad=None):
        kh, kw, cin, cout = w_hwio.shape
        if cin_pad is not None and cin_pad > cin:
            w_hwio = jnp.pad(w_hwio, ((0, 0), (0, 0), (0, cin_pad - cin), (0, 0)))
            cin = cin_pad
        return pad_last(w_hwio.reshape(kh * kw * cin, cout)).astype(jnp.bfloat16)

    def bias2d(b):
        return pad_last(b.reshape(1, -1).astype(jnp.float32))

    oh, ow = _conv_out_hw(h, w)
    p = oh * ow
    # fc_w1 rows: PyTorch order c*P + p  ->  kernel order p*C_PAD + c
    fc1 = params["fc_w1"].reshape(64, p, 512)
    fc1 = jnp.transpose(fc1, (1, 0, 2))
    fc1 = jnp.pad(fc1, ((0, 0), (0, C_PAD - 64), (0, 0)))
    fc1 = fc1.reshape(p * C_PAD, 512).astype(jnp.bfloat16)

    return {
        "w1": conv_wmat(params["w1"] / 256.0),           # fold x/256 scale
        "b1": bias2d(params["b1"]),
        "w2": conv_wmat(params["w2"], cin_pad=C_PAD),
        "b2": bias2d(params["b2"]),
        "w3": conv_wmat(params["w3"], cin_pad=C_PAD),
        "b3": bias2d(params["b3"]),
        "fc_w1": fc1,
        "fc_b1": bias2d(params["fc_b1"]),
        "fc_w2": pad_last(params["fc_w2"]).astype(jnp.bfloat16),
        "fc_b2": bias2d(params["fc_b2"]),
    }


# ----------------------------------------------------------------------------
# Forward pass
# ----------------------------------------------------------------------------
@functools.partial(jax.jit, static_argnums=(2,))
def dqn_forward(kparams, x_nchw, n_actions):
    # uint8 NCHW -> bf16 NHWC (values 0..255 exact in bf16; /256 is in w1).
    x = jnp.transpose(x_nchw, (0, 2, 3, 1)).astype(jnp.bfloat16)
    x = conv2d_act(x, kparams["w1"], kparams["b1"], 8, 8, 4, "mish")
    x = conv2d_act(x, kparams["w2"], kparams["b2"], 4, 4, 2, "mish")
    x = conv2d_act(x, kparams["w3"], kparams["b3"], 3, 3, 1, "mish")
    # Flatten directly in NHWC(+padded C) order; fc_w1 rows were permuted/padded
    # to match the PyTorch (N, C*H*W) flatten semantics.
    flat = x.reshape(x.shape[0], -1)
    return fc_head(flat, kparams["fc_w1"], kparams["fc_b1"],
                   kparams["fc_w2"], kparams["fc_b2"], n_actions)


# ----------------------------------------------------------------------------
# Pure-JAX reference (bf16 matmul inputs, f32 accumulation — same arithmetic)
# ----------------------------------------------------------------------------
def _mish_ref(x):
    return x * jnp.tanh(jax.nn.softplus(x))


def dqn_forward_ref(params, x_nchw):
    fx = x_nchw.astype(jnp.float32) / 256.0
    x = jnp.transpose(fx, (0, 2, 3, 1))

    def conv(x, w, b, s):
        y = lax.conv_general_dilated(
            x.astype(jnp.bfloat16), w.astype(jnp.bfloat16),
            window_strides=(s, s), padding="VALID",
            dimension_numbers=("NHWC", "HWIO", "NHWC"),
            preferred_element_type=jnp.float32)
        return y + b

    x = _mish_ref(conv(x, params["w1"], params["b1"], 4))
    x = _mish_ref(conv(x, params["w2"], params["b2"], 2))
    x = _mish_ref(conv(x, params["w3"], params["b3"], 1))
    n = x.shape[0]
    flat = jnp.transpose(x, (0, 3, 1, 2)).reshape(n, -1)
    h = jnp.maximum(
        jnp.dot(flat.astype(jnp.bfloat16), params["fc_w1"].astype(jnp.bfloat16),
                preferred_element_type=jnp.float32) + params["fc_b1"], 0.0)
    return jnp.dot(h.astype(jnp.bfloat16), params["fc_w2"].astype(jnp.bfloat16),
                   preferred_element_type=jnp.float32) + params["fc_b2"]


if __name__ == "__main__":
    # Small conv-stack-compatible shapes: 36 -> 8 -> 3 -> 1 through the three
    # VALID convs (strides 4/2/1). batch=2, channels=4, n_actions=6.
    B, C, H, W = 2, 4, 36, 36
    N_ACTIONS = 6

    key = jax.random.PRNGKey(0)
    pkey, xkey = jax.random.split(key)
    raw_params = init_dqn_params(pkey, C, H, W, N_ACTIONS)
    kparams = prepare_params(raw_params, C, H, W, N_ACTIONS)

    # uint8 frames, as in typical DQN usage (forward divides by 256).
    x = jax.random.randint(xkey, (B, C, H, W), 0, 256, dtype=jnp.int32)
    x = x.astype(jnp.uint8)

    out = jax.block_until_ready(dqn_forward(kparams, x, N_ACTIONS))
    assert out.shape == (B, N_ACTIONS), out.shape

    ref = jax.block_until_ready(dqn_forward_ref(raw_params, x))
    err = float(jnp.max(jnp.abs(out - ref)))
    assert jnp.allclose(out, ref, atol=1e-2, rtol=1e-2), err

    print("KERNEL_OK")
</pallas_src>

<mosaic_0001>
module attributes {stable_mosaic.version = 11 : i64} {
  func.func @_matmul_bias_act_kernel(%arg0: i32, %arg1: i32, %arg2: i32, %arg3: memref<128x256xbf16, #tpu.memory_space<vmem>>, %arg4: memref<256x128xbf16, #tpu.memory_space<vmem>>, %arg5: memref<1x128xf32, #tpu.memory_space<vmem>>, %arg6: memref<128x128xbf16, #tpu.memory_space<vmem>>, %arg7: memref<128x128xf32, #tpu.memory_space<vmem>>) attributes {dimension_semantics = [#tpu.dimension_semantics<parallel>, #tpu.dimension_semantics<parallel>, #tpu.dimension_semantics<arbitrary>], iteration_bounds = array<i64: 1, 1, 1>, scalar_prefetch = 0 : i64, scratch_operands = 1 : i64, tpu.core_type = #tpu.core_type<tc>, window_params = [{transform_indices = @transform_0, window_bounds = array<i64: 128, 256>}, {transform_indices = @transform_1, window_bounds = array<i64: 256, 128>}, {transform_indices = @transform_2, window_bounds = array<i64: 1, 128>}, {transform_indices = @transform_3, window_bounds = array<i64: 128, 128>}]} {
    %c0_i32 = arith.constant 0 : i32
    %0 = arith.cmpi eq, %arg2, %c0_i32 : i32
    %1 = arith.extui %0 : i1 to i32
    %c0_i32_0 = arith.constant 0 : i32
    %2 = arith.cmpi ne, %1, %c0_i32_0 : i32
    scf.if %2 {
      %cst_10 = arith.constant 0.000000e+00 : f32
      %12 = vector.broadcast %cst_10 : f32 to vector<128x128xf32>
      %c0_11 = arith.constant 0 : index
      %c0_12 = arith.constant 0 : index
      %13 = vector.load %arg7[%c0_11, %c0_12] : memref<128x128xf32, #tpu.memory_space<vmem>>, vector<128x128xf32>
      tpu.vector_store %arg7[%c0_11, %c0_12], %12 {strides = array<i32>} : memref<128x128xf32, #tpu.memory_space<vmem>>, vector<128x128xf32>,
    } else {
    }
    %c0 = arith.constant 0 : index
    %c0_1 = arith.constant 0 : index
    %3 = vector.load %arg7[%c0, %c0_1] : memref<128x128xf32, #tpu.memory_space<vmem>>, vector<128x128xf32>
    %c0_2 = arith.constant 0 : index
    %c0_3 = arith.constant 0 : index
    %4 = vector.load %arg3[%c0_2, %c0_3] : memref<128x256xbf16, #tpu.memory_space<vmem>>, vector<128x256xbf16>
    %c0_4 = arith.constant 0 : index
    %c0_5 = arith.constant 0 : index
    %5 = vector.load %arg4[%c0_4, %c0_5] : memref<256x128xbf16, #tpu.memory_space<vmem>>, vector<256x128xbf16>
    %cst = arith.constant dense<0.000000e+00> : vector<128x128xf32>
    %6 = tpu.matmul %4, %5, %cst {dimension_numbers = #tpu.dot_dimension_numbers<[1], [0], [0], [1], [0, 0, 1, 1], [], []>} : vector<128x256xbf16>, vector<256x128xbf16>, vector<128x128xf32> -> vector<128x128xf32>
    %7 = arith.addf %3, %6 : vector<128x128xf32>
    %c0_6 = arith.constant 0 : index
    %c0_7 = arith.constant 0 : index
    %8 = vector.load %arg7[%c0_6, %c0_7] : memref<128x128xf32, #tpu.memory_space<vmem>>, vector<128x128xf32>
    tpu.vector_store %arg7[%c0_6, %c0_7], %7 {strides = array<i32>} : memref<128x128xf32, #tpu.memory_space<vmem>>, vector<128x128xf32>,
    %c0_i32_8 = arith.constant 0 : i32
    %9 = arith.cmpi eq, %arg2, %c0_i32_8 : i32
    %10 = arith.extui %9 : i1 to i32
    %c0_i32_9 = arith.constant 0 : i32
    %11 = arith.cmpi ne, %10, %c0_i32_9 : i32
    scf.if %11 {
      %c0_10 = arith.constant 0 : index
      %c0_11 = arith.constant 0 : index
      %12 = vector.load %arg7[%c0_10, %c0_11] : memref<128x128xf32, #tpu.memory_space<vmem>>, vector<128x128xf32>
      %c0_12 = arith.constant 0 : index
      %c0_13 = arith.constant 0 : index
      %13 = vector.load %arg5[%c0_12, %c0_13] : memref<1x128xf32, #tpu.memory_space<vmem>>, vector<1x128xf32>
      %14 = vector.broadcast %13 : vector<1x128xf32> to vector<128x128xf32>
      %15 = arith.addf %12, %14 : vector<128x128xf32>
      %cst_14 = arith.constant 2.000000e+01 : f32
      %16 = vector.broadcast %cst_14 : f32 to vector<128x128xf32>
      %17 = arith.minimumf %15, %16 : vector<128x128xf32>
      %18 = math.exp %17 : vector<128x128xf32>
      %cst_15 = arith.constant 2.000000e+00 : f32
      %19 = vector.broadcast %cst_15 : f32 to vector<128x128xf32>
      %20 = arith.addf %18, %19 : vector<128x128xf32>
      %21 = arith.mulf %18, %20 : vector<128x128xf32>
      %cst_16 = arith.constant 2.000000e+01 : f32
      %22 = vector.broadcast %cst_16 : f32 to vector<128x128xf32>
      %23 = arith.cmpf ogt, %15, %22 : vector<128x128xf32>
      %cst_17 = arith.constant 2.000000e+00 : f32
      %24 = vector.broadcast %cst_17 : f32 to vector<128x128xf32>
      %25 = arith.addf %21, %24 : vector<128x128xf32>
      %26 = arith.divf %21, %25 : vector<128x128xf32>
      %27 = arith.mulf %15, %26 : vector<128x128xf32>
      %28 = arith.select %23, %15, %27 : vector<128x128xi1>, vector<128x128xf32>
      %29 = arith.truncf %28 : vector<128x128xf32> to vector<128x128xbf16>
      %c0_18 = arith.constant 0 : index
      %c0_19 = arith.constant 0 : index
      %30 = vector.load %arg6[%c0_18, %c0_19] : memref<128x128xbf16, #tpu.memory_space<vmem>>, vector<128x128xbf16>
      tpu.vector_store %arg6[%c0_18, %c0_19], %29 {strides = array<i32>} : memref<128x128xbf16, #tpu.memory_space<vmem>>, vector<128x128xbf16>,
    } else {
    }
    return
  }
  func.func @transform_0(%arg0: i32, %arg1: i32, %arg2: i32) -> (i32, i32) {
    %c0_i32 = arith.constant 0 : i32
    return %arg0, %arg2 : i32, i32
  }
  func.func @transform_1(%arg0: i32, %arg1: i32, %arg2: i32) -> (i32, i32) {
    %c0_i32 = arith.constant 0 : i32
    return %arg2, %arg1 : i32, i32
  }
  func.func @transform_2(%arg0: i32, %arg1: i32, %arg2: i32) -> (i32, i32) {
    %c0_i32 = arith.constant 0 : i32
    %c0_i32_0 = arith.constant 0 : i32
    return %c0_i32, %arg1 : i32, i32
  }
  func.func @transform_3(%arg0: i32, %arg1: i32, %arg2: i32) -> (i32, i32) {
    %c0_i32 = arith.constant 0 : i32
    return %arg0, %arg1 : i32, i32
  }
}

module attributes {stable_mosaic.version = 11 : i64} {
  func.func @_matmul_bias_act_kernel(%arg0: i32, %arg1: i32, %arg2: i32, %arg3: memref<32x512xbf16, #tpu.memory_space<vmem>>, %arg4: memref<512x128xbf16, #tpu.memory_space<vmem>>, %arg5: memref<1x128xf32, #tpu.memory_space<vmem>>, %arg6: memref<32x128xbf16, #tpu.memory_space<vmem>>, %arg7: memref<32x128xf32, #tpu.memory_space<vmem>>) attributes {dimension_semantics = [#tpu.dimension_semantics<parallel>, #tpu.dimension_semantics<parallel>, #tpu.dimension_semantics<arbitrary>], iteration_bounds = array<i64: 1, 1, 4>, scalar_prefetch = 0 : i64, scratch_operands = 1 : i64, tpu.core_type = #tpu.core_type<tc>, window_params = [{transform_indices = @transform_0, window_bounds = array<i64: 32, 512>}, {transform_indices = @transform_1, window_bounds = array<i64: 512, 128>}, {transform_indices = @transform_2, window_bounds = array<i64: 1, 128>}, {transform_indices = @transform_3, window_bounds = array<i64: 32, 128>}]} {
    %c0_i32 = arith.constant 0 : i32
    %0 = arith.cmpi eq, %arg2, %c0_i32 : i32
    %1 = arith.extui %0 : i1 to i32
    %c0_i32_0 = arith.constant 0 : i32
    %2 = arith.cmpi ne, %1, %c0_i32_0 : i32
    scf.if %2 {
      %cst_9 = arith.constant 0.000000e+00 : f32
      %12 = vector.broadcast %cst_9 : f32 to vector<32x128xf32>
      %c0_10 = arith.constant 0 : index
      %c0_11 = arith.constant 0 : index
      %13 = vector.load %arg7[%c0_10, %c0_11] : memref<32x128xf32, #tpu.memory_space<vmem>>, vector<32x128xf32>
      tpu.vector_store %arg7[%c0_10, %c0_11], %12 {strides = array<i32>} : memref<32x128xf32, #tpu.memory_space<vmem>>, vector<32x128xf32>,
    } else {
    }
    %c0 = arith.constant 0 : index
    %c0_1 = arith.constant 0 : index
    %3 = vector.load %arg7[%c0, %c0_1] : memref<32x128xf32, #tpu.memory_space<vmem>>, vector<32x128xf32>
    %c0_2 = arith.constant 0 : index
    %c0_3 = arith.constant 0 : index
    %4 = vector.load %arg3[%c0_2, %c0_3] : memref<32x512xbf16, #tpu.memory_space<vmem>>, vector<32x512xbf16>
    %c0_4 = arith.constant 0 : index
    %c0_5 = arith.constant 0 : index
    %5 = vector.load %arg4[%c0_4, %c0_5] : memref<512x128xbf16, #tpu.memory_space<vmem>>, vector<512x128xbf16>
    %cst = arith.constant dense<0.000000e+00> : vector<32x128xf32>
    %6 = tpu.matmul %4, %5, %cst {dimension_numbers = #tpu.dot_dimension_numbers<[1], [0], [0], [1], [0, 0, 1, 1], [], []>} : vector<32x512xbf16>, vector<512x128xbf16>, vector<32x128xf32> -> vector<32x128xf32>
    %7 = arith.addf %3, %6 : vector<32x128xf32>
    %c0_6 = arith.constant 0 : index
    %c0_7 = arith.constant 0 : index
    %8 = vector.load %arg7[%c0_6, %c0_7] : memref<32x128xf32, #tpu.memory_space<vmem>>, vector<32x128xf32>
    tpu.vector_store %arg7[%c0_6, %c0_7], %7 {strides = array<i32>} : memref<32x128xf32, #tpu.memory_space<vmem>>, vector<32x128xf32>,
    %c3_i32 = arith.constant 3 : i32
    %9 = arith.cmpi eq, %arg2, %c3_i32 : i32
    %10 = arith.extui %9 : i1 to i32
    %c0_i32_8 = arith.constant 0 : i32
    %11 = arith.cmpi ne, %10, %c0_i32_8 : i32
    scf.if %11 {
      %c0_9 = arith.constant 0 : index
      %c0_10 = arith.constant 0 : index
      %12 = vector.load %arg7[%c0_9, %c0_10] : memref<32x128xf32, #tpu.memory_space<vmem>>, vector<32x128xf32>
      %c0_11 = arith.constant 0 : index
      %c0_12 = arith.constant 0 : index
      %13 = vector.load %arg5[%c0_11, %c0_12] : memref<1x128xf32, #tpu.memory_space<vmem>>, vector<1x128xf32>
      %14 = vector.broadcast %13 : vector<1x128xf32> to vector<32x128xf32>
      %15 = arith.addf %12, %14 : vector<32x128xf32>
      %cst_13 = arith.constant 2.000000e+01 : f32
      %16 = vector.broadcast %cst_13 : f32 to vector<32x128xf32>
      %17 = arith.minimumf %15, %16 : vector<32x128xf32>
      %18 = math.exp %17 : vector<32x128xf32>
      %cst_14 = arith.constant 2.000000e+00 : f32
      %19 = vector.broadcast %cst_14 : f32 to vector<32x128xf32>
      %20 = arith.addf %18, %19 : vector<32x128xf32>
      %21 = arith.mulf %18, %20 : vector<32x128xf32>
      %cst_15 = arith.constant 2.000000e+01 : f32
      %22 = vector.broadcast %cst_15 : f32 to vector<32x128xf32>
      %23 = arith.cmpf ogt, %15, %22 : vector<32x128xf32>
      %cst_16 = arith.constant 2.000000e+00 : f32
      %24 = vector.broadcast %cst_16 : f32 to vector<32x128xf32>
      %25 = arith.addf %21, %24 : vector<32x128xf32>
      %26 = arith.divf %21, %25 : vector<32x128xf32>
      %27 = arith.mulf %15, %26 : vector<32x128xf32>
      %28 = arith.select %23, %15, %27 : vector<32x128xi1>, vector<32x128xf32>
      %29 = arith.truncf %28 : vector<32x128xf32> to vector<32x128xbf16>
      %c0_17 = arith.constant 0 : index
      %c0_18 = arith.constant 0 : index
      %30 = vector.load %arg6[%c0_17, %c0_18] : memref<32x128xbf16, #tpu.memory_space<vmem>>, vector<32x128xbf16>
      tpu.vector_store %arg6[%c0_17, %c0_18], %29 {strides = array<i32>} : memref<32x128xbf16, #tpu.memory_space<vmem>>, vector<32x128xbf16>,
    } else {
    }
    return
  }
  func.func @transform_0(%arg0: i32, %arg1: i32, %arg2: i32) -> (i32, i32) {
    %c0_i32 = arith.constant 0 : i32
    return %arg0, %arg2 : i32, i32
  }
  func.func @transform_1(%arg0: i32, %arg1: i32, %arg2: i32) -> (i32, i32) {
    %c0_i32 = arith.constant 0 : i32
    return %arg2, %arg1 : i32, i32
  }
  func.func @transform_2(%arg0: i32, %arg1: i32, %arg2: i32) -> (i32, i32) {
    %c0_i32 = arith.constant 0 : i32
    %c0_i32_0 = arith.constant 0 : i32
    return %c0_i32, %arg1 : i32, i32
  }
  func.func @transform_3(%arg0: i32, %arg1: i32, %arg2: i32) -> (i32, i32) {
    %c0_i32 = arith.constant 0 : i32
    return %arg0, %arg1 : i32, i32
  }
}

module attributes {stable_mosaic.version = 11 : i64} {
  func.func @_fc_head_kernel(%arg0: i32, %arg1: memref<32x128xbf16, #tpu.memory_space<vmem>>, %arg2: memref<128x512xbf16, #tpu.memory_space<vmem>>, %arg3: memref<1x512xf32, #tpu.memory_space<vmem>>, %arg4: memref<512x128xbf16, #tpu.memory_space<vmem>>, %arg5: memref<1x128xf32, #tpu.memory_space<vmem>>, %arg6: memref<32x128xf32, #tpu.memory_space<vmem>>) attributes {dimension_semantics = [#tpu.dimension_semantics<parallel>], iteration_bounds = array<i64: 1>, scalar_prefetch = 0 : i64, scratch_operands = 0 : i64, tpu.core_type = #tpu.core_type<tc>, window_params = [{transform_indices = @transform_0, window_bounds = array<i64: 32, 128>}, {pipeline_mode = #tpu.pipeline_mode<synchronous>, transform_indices = @transform_1, window_bounds = array<i64: 128, 512>}, {pipeline_mode = #tpu.pipeline_mode<synchronous>, transform_indices = @transform_2, window_bounds = array<i64: 1, 512>}, {pipeline_mode = #tpu.pipeline_mode<synchronous>, transform_indices = @transform_3, window_bounds = array<i64: 512, 128>}, {pipeline_mode = #tpu.pipeline_mode<synchronous>, transform_indices = @transform_4, window_bounds = array<i64: 1, 128>}, {transform_indices = @transform_5, window_bounds = array<i64: 32, 128>}]} {
    %c0 = arith.constant 0 : index
    %c0_0 = arith.constant 0 : index
    %0 = vector.load %arg1[%c0, %c0_0] : memref<32x128xbf16, #tpu.memory_space<vmem>>, vector<32x128xbf16>
    %c0_1 = arith.constant 0 : index
    %c0_2 = arith.constant 0 : index
    %1 = vector.load %arg2[%c0_1, %c0_2] : memref<128x512xbf16, #tpu.memory_space<vmem>>, vector<128x512xbf16>
    %cst = arith.constant dense<0.000000e+00> : vector<32x512xf32>
    %2 = tpu.matmul %0, %1, %cst {dimension_numbers = #tpu.dot_dimension_numbers<[1], [0], [0], [1], [0, 0, 1, 1], [], []>} : vector<32x128xbf16>, vector<128x512xbf16>, vector<32x512xf32> -> vector<32x512xf32>
    %c0_3 = arith.constant 0 : index
    %c0_4 = arith.constant 0 : index
    %3 = vector.load %arg3[%c0_3, %c0_4] : memref<1x512xf32, #tpu.memory_space<vmem>>, vector<1x512xf32>
    %4 = vector.broadcast %3 : vector<1x512xf32> to vector<32x512xf32>
    %5 = arith.addf %2, %4 : vector<32x512xf32>
    %cst_5 = arith.constant 0.000000e+00 : f32
    %6 = vector.broadcast %cst_5 : f32 to vector<32x512xf32>
    %7 = arith.maximumf %5, %6 : vector<32x512xf32>
    %8 = arith.truncf %7 : vector<32x512xf32> to vector<32x512xbf16>
    %c0_6 = arith.constant 0 : index
    %c0_7 = arith.constant 0 : index
    %9 = vector.load %arg4[%c0_6, %c0_7] : memref<512x128xbf16, #tpu.memory_space<vmem>>, vector<512x128xbf16>
    %cst_8 = arith.constant dense<0.000000e+00> : vector<32x128xf32>
    %10 = tpu.matmul %8, %9, %cst_8 {dimension_numbers = #tpu.dot_dimension_numbers<[1], [0], [0], [1], [0, 0, 1, 1], [], []>} : vector<32x512xbf16>, vector<512x128xbf16>, vector<32x128xf32> -> vector<32x128xf32>
    %c0_9 = arith.constant 0 : index
    %c0_10 = arith.constant 0 : index
    %11 = vector.load %arg5[%c0_9, %c0_10] : memref<1x128xf32, #tpu.memory_space<vmem>>, vector<1x128xf32>
    %12 = vector.broadcast %11 : vector<1x128xf32> to vector<32x128xf32>
    %13 = arith.addf %10, %12 : vector<32x128xf32>
    %c0_11 = arith.constant 0 : index
    %c0_12 = arith.constant 0 : index
    %14 = vector.load %arg6[%c0_11, %c0_12] : memref<32x128xf32, #tpu.memory_space<vmem>>, vector<32x128xf32>
    tpu.vector_store %arg6[%c0_11, %c0_12], %13 {strides = array<i32>} : memref<32x128xf32, #tpu.memory_space<vmem>>, vector<32x128xf32>,
    return
  }
  func.func @transform_0(%arg0: i32) -> (i32, i32) {
    %c0_i32 = arith.constant 0 : i32
    %c0_i32_0 = arith.constant 0 : i32
    return %arg0, %c0_i32 : i32, i32
  }
  func.func @transform_1(%arg0: i32) -> (i32, i32) {
    %c0_i32 = arith.constant 0 : i32
    %c0_i32_0 = arith.constant 0 : i32
    %c0_i32_1 = arith.constant 0 : i32
    return %c0_i32, %c0_i32_0 : i32, i32
  }
  func.func @transform_2(%arg0: i32) -> (i32, i32) {
    %c0_i32 = arith.constant 0 : i32
    %c0_i32_0 = arith.constant 0 : i32
    %c0_i32_1 = arith.constant 0 : i32
    return %c0_i32, %c0_i32_0 : i32, i32
  }
  func.func @transform_3(%arg0: i32) -> (i32, i32) {
    %c0_i32 = arith.constant 0 : i32
    %c0_i32_0 = arith.constant 0 : i32
    %c0_i32_1 = arith.constant 0 : i32
    return %c0_i32, %c0_i32_0 : i32, i32
  }
  func.func @transform_4(%arg0: i32) -> (i32, i32) {
    %c0_i32 = arith.constant 0 : i32
    %c0_i32_0 = arith.constant 0 : i32
    %c0_i32_1 = arith.constant 0 : i32
    return %c0_i32, %c0_i32_0 : i32, i32
  }
  func.func @transform_5(%arg0: i32) -> (i32, i32) {
    %c0_i32 = arith.constant 0 : i32
    %c0_i32_0 = arith.constant 0 : i32
    return %arg0, %c0_i32 : i32, i32
  }
}

module attributes {stable_mosaic.version = 11 : i64} {
  func.func @_matmul_bias_act_kernel(%arg0: i32, %arg1: i32, %arg2: i32, %arg3: memref<32x128xbf16, #tpu.memory_space<vmem>>, %arg4: memref<128x128xbf16, #tpu.memory_space<vmem>>, %arg5: memref<1x128xf32, #tpu.memory_space<vmem>>, %arg6: memref<32x128xbf16, #tpu.memory_space<vmem>>, %arg7: memref<32x128xf32, #tpu.memory_space<vmem>>) attributes {dimension_semantics = [#tpu.dimension_semantics<parallel>, #tpu.dimension_semantics<parallel>, #tpu.dimension_semantics<arbitrary>], iteration_bounds = array<i64: 1, 1, 9>, scalar_prefetch = 0 : i64, scratch_operands = 1 : i64, tpu.core_type = #tpu.core_type<tc>, window_params = [{transform_indices = @transform_0, window_bounds = array<i64: 32, 128>}, {transform_indices = @transform_1, window_bounds = array<i64: 128, 128>}, {transform_indices = @transform_2, window_bounds = array<i64: 1, 128>}, {transform_indices = @transform_3, window_bounds = array<i64: 32, 128>}]} {
    %c0_i32 = arith.constant 0 : i32
    %0 = arith.cmpi eq, %arg2, %c0_i32 : i32
    %1 = arith.extui %0 : i1 to i32
    %c0_i32_0 = arith.constant 0 : i32
    %2 = arith.cmpi ne, %1, %c0_i32_0 : i32
    scf.if %2 {
      %cst_9 = arith.constant 0.000000e+00 : f32
      %12 = vector.broadcast %cst_9 : f32 to vector<32x128xf32>
      %c0_10 = arith.constant 0 : index
      %c0_11 = arith.constant 0 : index
      %13 = vector.load %arg7[%c0_10, %c0_11] : memref<32x128xf32, #tpu.memory_space<vmem>>, vector<32x128xf32>
      tpu.vector_store %arg7[%c0_10, %c0_11], %12 {strides = array<i32>} : memref<32x128xf32, #tpu.memory_space<vmem>>, vector<32x128xf32>,
    } else {
    }
    %c0 = arith.constant 0 : index
    %c0_1 = arith.constant 0 : index
    %3 = vector.load %arg7[%c0, %c0_1] : memref<32x128xf32, #tpu.memory_space<vmem>>, vector<32x128xf32>
    %c0_2 = arith.constant 0 : index
    %c0_3 = arith.constant 0 : index
    %4 = vector.load %arg3[%c0_2, %c0_3] : memref<32x128xbf16, #tpu.memory_space<vmem>>, vector<32x128xbf16>
    %c0_4 = arith.constant 0 : index
    %c0_5 = arith.constant 0 : index
    %5 = vector.load %arg4[%c0_4, %c0_5] : memref<128x128xbf16, #tpu.memory_space<vmem>>, vector<128x128xbf16>
    %cst = arith.constant dense<0.000000e+00> : vector<32x128xf32>
    %6 = tpu.matmul %4, %5, %cst {dimension_numbers = #tpu.dot_dimension_numbers<[1], [0], [0], [1], [0, 0, 1, 1], [], []>} : vector<32x128xbf16>, vector<128x128xbf16>, vector<32x128xf32> -> vector<32x128xf32>
    %7 = arith.addf %3, %6 : vector<32x128xf32>
    %c0_6 = arith.constant 0 : index
    %c0_7 = arith.constant 0 : index
    %8 = vector.load %arg7[%c0_6, %c0_7] : memref<32x128xf32, #tpu.memory_space<vmem>>, vector<32x128xf32>
    tpu.vector_store %arg7[%c0_6, %c0_7], %7 {strides = array<i32>} : memref<32x128xf32, #tpu.memory_space<vmem>>, vector<32x128xf32>,
    %c8_i32 = arith.constant 8 : i32
    %9 = arith.cmpi eq, %arg2, %c8_i32 : i32
    %10 = arith.extui %9 : i1 to i32
    %c0_i32_8 = arith.constant 0 : i32
    %11 = arith.cmpi ne, %10, %c0_i32_8 : i32
    scf.if %11 {
      %c0_9 = arith.constant 0 : index
      %c0_10 = arith.constant 0 : index
      %12 = vector.load %arg7[%c0_9, %c0_10] : memref<32x128xf32, #tpu.memory_space<vmem>>, vector<32x128xf32>
      %c0_11 = arith.constant 0 : index
      %c0_12 = arith.constant 0 : index
      %13 = vector.load %arg5[%c0_11, %c0_12] : memref<1x128xf32, #tpu.memory_space<vmem>>, vector<1x128xf32>
      %14 = vector.broadcast %13 : vector<1x128xf32> to vector<32x128xf32>
      %15 = arith.addf %12, %14 : vector<32x128xf32>
      %cst_13 = arith.constant 2.000000e+01 : f32
      %16 = vector.broadcast %cst_13 : f32 to vector<32x128xf32>
      %17 = arith.minimumf %15, %16 : vector<32x128xf32>
      %18 = math.exp %17 : vector<32x128xf32>
      %cst_14 = arith.constant 2.000000e+00 : f32
      %19 = vector.broadcast %cst_14 : f32 to vector<32x128xf32>
      %20 = arith.addf %18, %19 : vector<32x128xf32>
      %21 = arith.mulf %18, %20 : vector<32x128xf32>
      %cst_15 = arith.constant 2.000000e+01 : f32
      %22 = vector.broadcast %cst_15 : f32 to vector<32x128xf32>
      %23 = arith.cmpf ogt, %15, %22 : vector<32x128xf32>
      %cst_16 = arith.constant 2.000000e+00 : f32
      %24 = vector.broadcast %cst_16 : f32 to vector<32x128xf32>
      %25 = arith.addf %21, %24 : vector<32x128xf32>
      %26 = arith.divf %21, %25 : vector<32x128xf32>
      %27 = arith.mulf %15, %26 : vector<32x128xf32>
      %28 = arith.select %23, %15, %27 : vector<32x128xi1>, vector<32x128xf32>
      %29 = arith.truncf %28 : vector<32x128xf32> to vector<32x128xbf16>
      %c0_17 = arith.constant 0 : index
      %c0_18 = arith.constant 0 : index
      %30 = vector.load %arg6[%c0_17, %c0_18] : memref<32x128xbf16, #tpu.memory_space<vmem>>, vector<32x128xbf16>
      tpu.vector_store %arg6[%c0_17, %c0_18], %29 {strides = array<i32>} : memref<32x128xbf16, #tpu.memory_space<vmem>>, vector<32x128xbf16>,
    } else {
    }
    return
  }
  func.func @transform_0(%arg0: i32, %arg1: i32, %arg2: i32) -> (i32, i32) {
    %c0_i32 = arith.constant 0 : i32
    return %arg0, %arg2 : i32, i32
  }
  func.func @transform_1(%arg0: i32, %arg1: i32, %arg2: i32) -> (i32, i32) {
    %c0_i32 = arith.constant 0 : i32
    return %arg2, %arg1 : i32, i32
  }
  func.func @transform_2(%arg0: i32, %arg1: i32, %arg2: i32) -> (i32, i32) {
    %c0_i32 = arith.constant 0 : i32
    %c0_i32_0 = arith.constant 0 : i32
    return %c0_i32, %arg1 : i32, i32
  }
  func.func @transform_3(%arg0: i32, %arg1: i32, %arg2: i32) -> (i32, i32) {
    %c0_i32 = arith.constant 0 : i32
    return %arg0, %arg1 : i32, i32
  }
}

</mosaic_0001>

<bundles_post_ra>
// kernel: dqn_forward.4
= control target key start
LH: loop header
LB: loop body
LE: loop exit
PB: predicated region body
PF: predicated region fallthrough
CT: control target
= control target key end

     0   :  { %s1305_s1 = inlined_call_operand.vmem [shape: bf16[256,128], index: 1, kind: input, shape index: {}]   ;;  %s1306_s0 = inlined_call_operand.vmem [shape: bf16[128,256], index: 0, kind: input, shape index: {}]   ;;  %s1307_s2 = inlined_call_operand.vmem [shape: f32[1,128], index: 2, kind: input, shape index: {}]   ;;  %s1308_s3 = inlined_call_operand.vmem [shape: bf16[128,128], index: 3, kind: output, shape index: {}]  }
   0x1   :  { %v898_v0 = vld [vmem:[%s1305_s1 + $0x40] sm:$0xff]   ;;  %v900_v2 = vld [vmem:[%s1305_s1 + $0x48] sm:$0xff]   ;;  %v902_v4 = vld [vmem:[%s1305_s1 + $0x50] sm:$0xff]  }
   0x2   :  { %v899_v1 = vld [vmem:[%s1305_s1] sm:$0xff]   ;;  %818 = vmatprep.subr.bf16.mxu0 %v898_v0  ;;  %882 = vmatprep.subr.bf16.mxu1 %v898_v0  ;;  %v901_v3 = vld [vmem:[%s1305_s1 + $0x8] sm:$0xff]   ;;  %v903_v5 = vld [vmem:[%s1305_s1 + $0x10] sm:$0xff]  }
   0x3   :  { %819 = vmatpush3.bf16.msra.mxu0 %v899_v1  ;;  %890 = vmatpush3.bf16.msra.mxu1 %v899_v1  ;;  %v904_v6 = vld [vmem:[%s1305_s1 + $0x58] sm:$0xff]   ;;  %v906_v8 = vld [vmem:[%s1305_s1 + $0x60] sm:$0xff]   ;;  %v908_v10 = vld [vmem:[%s1305_s1 + $0x68] sm:$0xff]  }
   0x4   :  { %820 = vmatprep.subr.bf16.mxu0 %v900_v2  ;;  %883 = vmatprep.subr.bf16.mxu1 %v900_v2  ;;  %v905_v7 = vld [vmem:[%s1305_s1 + $0x18] sm:$0xff]   ;;  %v907_v9 = vld [vmem:[%s1305_s1 + $0x20] sm:$0xff]   ;;  %v909_v13 = vld [vmem:[%s1305_s1 + $0x28] sm:$0xff]  }
   0x5   :  { %v916_v11 = vld [vmem:[%s1306_s0 + $0x4] ss:$8 sps:$4 sm:$0xff]   ;;  %v910_v14 = vld [vmem:[%s1305_s1 + $0x70] sm:$0xff]   ;;  %v912_v16 = vld [vmem:[%s1305_s1 + $0x78] sm:$0xff]  }
   0x6   :  { %v919_v12 = vld [vmem:[%s1306_s0 + $0x44] ss:$8 sps:$4 sm:$0xff]   ;;  %307 = vmatprep.mubr.bf16.mxu0 %v916_v11  ;;  %v911_v15 = vld [vmem:[%s1305_s1 + $0x30] sm:$0xff]   ;;  %v913_v17 = vld [vmem:[%s1305_s1 + $0x38] sm:$0xff]  }
   0x7   :  { %821 = vmatpush3.bf16.msra.mxu0 %v901_v3  ;;  %891 = vmatpush3.bf16.msra.mxu1 %v901_v3  ;;  %v914_v18 = vld [vmem:[%s1306_s0] ss:$8 sps:$4 sm:$0xff]   ;;  %v920_v20 = vld [vmem:[%s1306_s0 + $0x14] ss:$8 sps:$4 sm:$0xff]   ;;  %v924_v22 = vld [vmem:[%s1306_s0 + $0x10] ss:$8 sps:$4 sm:$0xff]  }
   0x8   :  { %822 = vmatprep.subr.bf16.mxu0 %v902_v4  ;;  %884 = vmatprep.subr.bf16.mxu1 %v902_v4  ;;  %v917_v19 = vld [vmem:[%s1306_s0 + $0x40] ss:$8 sps:$4 sm:$0xff]   ;;  %v922_v21 = vld [vmem:[%s1306_s0 + $0x54] ss:$8 sps:$4 sm:$0xff]   ;;  %v925_v23 = vld [vmem:[%s1306_s0 + $0x50] ss:$8 sps:$4 sm:$0xff]  }
   0x9   :  { %339 = vmatprep.mubr.bf16.mxu1 %v919_v12  ;;  %v926_v24 = vld [vmem:[%s1306_s0 + $0x24] ss:$8 sps:$4 sm:$0xff]   ;;  %v930_v26 = vld [vmem:[%s1306_s0 + $0x20] ss:$8 sps:$4 sm:$0xff]   ;;  %v932_v28 = vld [vmem:[%s1306_s0 + $0x34] ss:$8 sps:$4 sm:$0xff]  }
   0xa   :  { %v928_v25 = vld [vmem:[%s1306_s0 + $0x64] ss:$8 sps:$4 sm:$0xff]   ;;  %v931_v27 = vld [vmem:[%s1306_s0 + $0x60] ss:$8 sps:$4 sm:$0xff]   ;;  %v934_v29 = vld [vmem:[%s1306_s0 + $0x74] ss:$8 sps:$4 sm:$0xff]  }
   0xb   :  { %823 = vmatpush3.bf16.msra.mxu0 %v903_v5  ;;  %892 = vmatpush3.bf16.msra.mxu1 %v903_v5  ;;  %v936_v30 = vld [vmem:[%s1306_s0 + $0x30] ss:$8 sps:$4 sm:$0xff]   ;;  %v1121_v35 = vld [vmem:[%s1307_s2] ss:$0 sm:$0xff] }
   0xc   :  { %824 = vmatprep.subr.bf16.mxu0 %v904_v6  ;;  %885 = vmatprep.subr.bf16.mxu1 %v904_v6  ;;  %v937_v31 = vld [vmem:[%s1306_s0 + $0x70] ss:$8 sps:$4 sm:$0xff]  }
   0xf   :  { %825 = vmatpush3.bf16.msra.mxu0 %v905_v7  ;;  %893 = vmatpush3.bf16.msra.mxu1 %v905_v7 }
  0x10   :  { %826 = vmatprep.subr.bf16.mxu0 %v906_v8  ;;  %886 = vmatprep.subr.bf16.mxu1 %v906_v8 }
  0x13   :  { %827 = vmatpush3.bf16.msra.mxu0 %v907_v9  ;;  %894 = vmatpush3.bf16.msra.mxu1 %v907_v9 }
  0x14   :  { %828 = vmatprep.subr.bf16.mxu0 %v908_v10  ;;  %887 = vmatprep.subr.bf16.mxu1 %v908_v10 }
  0x17   :  { %829 = vmatpush3.bf16.msra.mxu0 %v909_v13  ;;  %895 = vmatpush3.bf16.msra.mxu1 %v909_v13 }
  0x18   :  { %830 = vmatprep.subr.bf16.mxu0 %v910_v14  ;;  %888 = vmatprep.subr.bf16.mxu1 %v910_v14 }
  0x1b   :  { %831 = vmatpush3.bf16.msra.mxu0 %v911_v15  ;;  %896 = vmatpush3.bf16.msra.mxu1 %v911_v15 }
  0x1c   :  { %832 = vmatprep.subr.bf16.mxu0 %v912_v16  ;;  %889 = vmatprep.subr.bf16.mxu1 %v912_v16 }
  0x1f   :  { %833 = vmatpush3.bf16.msra.mxu0 %v913_v17  ;;  %897 = vmatpush3.bf16.msra.mxu1 %v913_v17 }
  0x22   :  { %308 = vmatmul.mubr.bf16.vlgmr.msra.gmra.mrb[0].mxu0 %v914_v18  ;;  %340 = vmatmul.mubr.bf16.vlgmr.msra.gmra.mrb[0].mxu1 %v917_v19 }
  0x23   :  { %315 = vmatprep.mubr.bf16.mxu0 %v920_v20  ;;  %347 = vmatprep.mubr.bf16.mxu1 %v922_v21 }
  0x2a   :  { %316 = vmatmul.mubr.bf16.gmra.mrb[4].mxu0 %v924_v22  ;;  %348 = vmatmul.mubr.bf16.gmra.mrb[4].mxu1 %v925_v23 }
  0x2b   :  { %323 = vmatprep.mubr.bf16.mxu0 %v926_v24  ;;  %355 = vmatprep.mubr.bf16.mxu1 %v928_v25 }
  0x32   :  { %324 = vmatmul.mubr.bf16.gmra.mrb[8].mxu0 %v930_v26  ;;  %356 = vmatmul.mubr.bf16.gmra.mrb[8].mxu1 %v931_v27 }
  0x33   :  { %331 = vmatprep.mubr.bf16.mxu0 %v932_v28  ;;  %363 = vmatprep.mubr.bf16.mxu1 %v934_v29 }
  0x3a   :  { %332 = vmatmul.mubr.bf16.gmra.mrb[12].mxu0 %v936_v30  ;;  %364 = vmatmul.mubr.bf16.gmra.mrb[12].mxu1 %v937_v31 }
  0xf5   :  { %v834_v32 = vpop.f32.mrb[0].mxu0  ;;  %v858_v33 = vpop.f32.mrb[0].mxu1 }
  0xf6   :  { %v835_v34 = vpop.f32.mrb[1].mxu0  ;;  %v859_v36 = vpop.f32.mrb[1].mxu1 }
  0xf7   :  { %v836_v37 = vadd.f32 %v835_v34, %v834_v32  ;;  %v860_v38 = vadd.f32 %v859_v36, %v858_v33  ;;  %v837_v39 = vpop.f32.mrb[2].mxu0  ;;  %v861_v40 = vpop.f32.mrb[2].mxu1 }
  0xf8   :  { %v838_v41 = vpop.f32.mrb[3].mxu0  ;;  %v862_v42 = vpop.f32.mrb[3].mxu1 }
  0xf9   :  { %v1124_v43 = vadd.f32 %v836_v37, %v1121_v35  ;;  %v1127_v44 = vadd.f32 %v860_v38, %v1121_v35  ;;  %v839_v45 = vadd.f32 %v838_v41, %v837_v39  ;;  %v863_v46 = vadd.f32 %v862_v42, %v861_v40 }
  0xfb   :  { %v446_v47 = vmin.f32 %v1124_v43, 20.0  ;;  %v454_v48 = vmin.f32 %v1127_v44, 20.0  ;;  %v1132_v49 = vadd.f32 %v839_v45, %v1121_v35  ;;  %v1135_v50 = vadd.f32 %v863_v46, %v1121_v35 }
  0xfc   :  { %vm526_vm0 = vcmp.gt.f32.partialorder %v1124_v43, 20.0  ;;  %vm534_vm1 = vcmp.gt.f32.partialorder %v1127_v44, 20.0 }
  0xfd   :  { %v462_v51 = vmul.f32 1.442695, %v446_v47  ;;  %v478_v52 = vmul.f32 1.442695, %v454_v48  ;;  %v840_v53 = vpop.f32.mrb[4].mxu0  ;;  %v864_v54 = vpop.f32.mrb[4].mxu1 }
  0xfe   :  { %v447_v55 = vmin.f32 %v1132_v49, 20.0  ;;  %v455_v56 = vmin.f32 %v1135_v50, 20.0  ;;  %v841_v57 = vpop.f32.mrb[5].mxu0  ;;  %v865_v58 = vpop.f32.mrb[5].mxu1  ;;  %vm527_vm2 = vcmp.gt.f32.partialorder %v1132_v49, 20.0  ;;  %vm535_vm3 = vcmp.gt.f32.partialorder %v1135_v50, 20.0 }
  0xff   :  { %938 = vpow2.f32 %v462_v51  ;;  %v842_v59 = vadd.f32 %v841_v57, %v840_v53  ;;  %v866_v60 = vadd.f32 %v865_v58, %v864_v54  ;;  %v843_v61 = vpop.f32.mrb[6].mxu0  ;;  %v867_v62 = vpop.f32.mrb[6].mxu1 }
 0x100   :  { %940 = vpow2.f32 %v478_v52  ;;  %v464_v63 = vmul.f32 1.442695, %v447_v55  ;;  %v480_v0 = vmul.f32 1.442695, %v455_v56  ;;  %v844_v1 = vpop.f32.mrb[7].mxu0  ;;  %v868_v2 = vpop.f32.mrb[7].mxu1 }
 0x101   :  { %v1140_v3 = vadd.f32 %v842_v59, %v1121_v35  ;;  %v1143_v4 = vadd.f32 %v866_v60, %v1121_v35  ;;  %v845_v5 = vadd.f32 %v844_v1, %v843_v61  ;;  %v869_v6 = vadd.f32 %v868_v2, %v867_v62 }
 0x102   :  { %942 = vpow2.f32 %v464_v63 }
 0x103   :  { %944 = vpow2.f32 %v480_v0  ;;  %v448_v7 = vmin.f32 %v1140_v3, 20.0  ;;  %v456_v8 = vmin.f32 %v1143_v4, 20.0  ;;  %v1148_v9 = vadd.f32 %v845_v5, %v1121_v35 }
 0x104   :  { %v1151_v10 = vadd.f32 %v869_v6, %v1121_v35  ;;  %vm528_vm4 = vcmp.gt.f32.partialorder %v1140_v3, 20.0  ;;  %vm536_vm5 = vcmp.gt.f32.partialorder %v1143_v4, 20.0 }
 0x105   :  { %v466_v11 = vmul.f32 1.442695, %v448_v7  ;;  %v482_v12 = vmul.f32 1.442695, %v456_v8  ;;  %v846_v13 = vpop.f32.mrb[8].mxu0  ;;  %v870_v14 = vpop.f32.mrb[8].mxu1 }
 0x106   :  { %v449_v15 = vmin.f32 %v1148_v9, 20.0  ;;  %v457_v16 = vmin.f32 %v1151_v10, 20.0  ;;  %v847_v17 = vpop.f32.mrb[9].mxu0  ;;  %v871_v18 = vpop.f32.mrb[9].mxu1  ;;  %vm529_vm6 = vcmp.gt.f32.partialorder %v1148_v9, 20.0  ;;  %vm537_vm7 = vcmp.gt.f32.partialorder %v1151_v10, 20.0 }
 0x107   :  { %946 = vpow2.f32 %v466_v11  ;;  %v848_v19 = vadd.f32 %v847_v17, %v846_v13  ;;  %v872_v20 = vadd.f32 %v871_v18, %v870_v14  ;;  %v849_v21 = vpop.f32.mrb[10].mxu0  ;;  %v873_v22 = vpop.f32.mrb[10].mxu1 }
 0x108   :  { %948 = vpow2.f32 %v482_v12  ;;  %v468_v23 = vmul.f32 1.442695, %v449_v15  ;;  %v484_v24 = vmul.f32 1.442695, %v457_v16  ;;  %v850_v25 = vpop.f32.mrb[11].mxu0  ;;  %v874_v26 = vpop.f32.mrb[11].mxu1 }
 0x109   :  { %v939_v27 = vpop.eup %938  ;;  %v1156_v28 = vadd.f32 %v848_v19, %v1121_v35  ;;  %v1159_v29 = vadd.f32 %v872_v20, %v1121_v35  ;;  %v851_v30 = vadd.f32 %v850_v25, %v849_v21  ;;  %v875_v31 = vadd.f32 %v874_v26, %v873_v22 }
 0x10a   :  { %v941_v32 = vpop.eup %940  ;;  %v494_v33 = vadd.f32 2.0, %v939_v27  ;;  %950 = vpow2.f32 %v468_v23 }
 0x10b   :  { %v502_v34 = vadd.f32 2.0, %v941_v32  ;;  %952 = vpow2.f32 %v484_v24  ;;  %v450_v36 = vmin.f32 %v1156_v28, 20.0  ;;  %v458_v39 = vmin.f32 %v1159_v29, 20.0 }
 0x10c   :  { %v943_v37 = vpop.eup %942  ;;  %v1162_v38 = vmul.f32 %v939_v27, %v494_v33  ;;  %v1166_v40 = vadd.f32 %v851_v30, %v1121_v35  ;;  %v1171_v47 = vadd.f32 %v875_v31, %v1121_v35  ;;  %vm530_vm8 = vcmp.gt.f32.partialorder %v1156_v28, 20.0 }
 0x10d   :  { %v945_v41 = vpop.eup %944  ;;  %v1168_v42 = vmul.f32 %v941_v32, %v502_v34  ;;  %v495_v45 = vadd.f32 2.0, %v943_v37  ;;  %v470_v46 = vmul.f32 1.442695, %v450_v36  ;;  %v852_v48 = vpop.f32.mrb[12].mxu0  ;;  %v486_v54 = vmul.f32 1.442695, %v458_v39 }
 0x10e   :  { %v876_v51 = vpop.f32.mrb[12].mxu1  ;;  %v542_v52 = vadd.f32 2.0, %v1162_v38  ;;  %v503_v53 = vadd.f32 2.0, %v945_v41  ;;  %v451_v55 = vmin.f32 %v1166_v40, 20.0  ;;  %v853_v56 = vpop.f32.mrb[13].mxu0  ;;  %v459_v62 = vmin.f32 %v1171_v47, 20.0 }
 0x10f   :  { %v550_v57 = vadd.f32 2.0, %v1168_v42  ;;  %v1176_v58 = vmul.f32 %v943_v37, %v495_v45  ;;  %954 = vpow2.f32 %v470_v46  ;;  %v877_v59 = vpop.f32.mrb[13].mxu1  ;;  %v855_v60 = vpop.f32.mrb[14].mxu0  ;;  %v854_v6 = vadd.f32 %v853_v56, %v852_v48 }
 0x110   :  { %956 = vrcp.f32 %v542_v52  ;;  %v1178_v61 = vmul.f32 %v945_v41, %v503_v53  ;;  %v879_v63 = vpop.f32.mrb[14].mxu1  ;;  %v856_v0 = vpop.f32.mrb[15].mxu0  ;;  %v472_v5 = vmul.f32 1.442695, %v451_v55  ;;  %v488_v13 = vmul.f32 1.442695, %v459_v62 }
 0x111   :  { %v947_v1 = vpop.eup %946  ;;  %958 = vrcp.f32 %v550_v57  ;;  %v543_v2 = vadd.f32 2.0, %v1176_v58  ;;  %v880_v7 = vpop.f32.mrb[15].mxu1  ;;  %v1184_v15 = vadd.f32 %v854_v6, %v1121_v35  ;;  %v878_v16 = vadd.f32 %v877_v59, %v876_v51 }
 0x112   :  { %v949_v8 = vpop.eup %948  ;;  %v551_v11 = vadd.f32 2.0, %v1178_v61  ;;  %v496_v12 = vadd.f32 2.0, %v947_v1  ;;  %960 = vpow2.f32 %v486_v54  ;;  %v857_v19 = vadd.f32 %v856_v0, %v855_v60 }
 0x113   :  { %962 = vrcp.f32 %v543_v2  ;;  %v504_v14 = vadd.f32 2.0, %v949_v8  ;;  %v881_v20 = vadd.f32 %v880_v7, %v879_v63  ;;  %v452_v24 = vmin.f32 %v1184_v15, 20.0 }
 0x114   :  { %v951_v17 = vpop.eup %950  ;;  %964 = vrcp.f32 %v551_v11  ;;  %v1186_v18 = vmul.f32 %v947_v1, %v496_v12  ;;  %v1196_v32 = vadd.f32 %v878_v16, %v1121_v35  ;;  %v1201_v34 = vadd.f32 %v857_v19, %v1121_v35 }
 0x115   :  { %v953_v21 = vpop.eup %952  ;;  %v1188_v22 = vmul.f32 %v949_v8, %v504_v14  ;;  %v497_v23 = vadd.f32 2.0, %v951_v17  ;;  %966 = vpow2.f32 %v472_v5  ;;  %v474_v31 = vmul.f32 1.442695, %v452_v24 }
 0x116   :  { %v544_v25 = vadd.f32 2.0, %v1186_v18  ;;  %v505_v26 = vadd.f32 2.0, %v953_v21  ;;  %968 = vpow2.f32 %v488_v13  ;;  %v460_v39 = vmin.f32 %v1196_v32, 20.0 }
 0x117   :  { %v552_v27 = vadd.f32 2.0, %v1188_v22  ;;  %v1193_v30 = vmul.f32 %v951_v17, %v497_v23  ;;  %v1207_v41 = vadd.f32 %v881_v20, %v1121_v35  ;;  %v453_v51 = vmin.f32 %v1201_v34, 20.0 }
 0x118   :  { %970 = vrcp.f32 %v544_v25  ;;  %v1198_v33 = vmul.f32 %v953_v21, %v505_v26  ;;  %v490_v54 = vmul.f32 1.442695, %v460_v39  ;;  %vm531_vm9 = vcmp.gt.f32.partialorder %v1166_v40, 20.0 }
 0x119   :  { %v955_v36 = vpop.eup %954  ;;  %972 = vrcp.f32 %v552_v27  ;;  %v545_v37 = vadd.f32 2.0, %v1193_v30  ;;  %v476_v57 = vmul.f32 1.442695, %v453_v51  ;;  %v461_v63 = vmin.f32 %v1207_v41, 20.0 }
 0x11a   :  { %v957_v45 = vpop.eup %956  ;;  %v553_v46 = vadd.f32 2.0, %v1198_v33  ;;  %v498_v48 = vadd.f32 2.0, %v955_v36  ;;  %974 = vpow2.f32 %v474_v31  ;;  %vm538_vm10 = vcmp.gt.f32.partialorder %v1159_v29, 20.0 }
 0x11b   :  { %v959_v52 = vpop.eup %958  ;;  %v559_v53 = vmul.f32 %v957_v45, %v1162_v38  ;;  %976 = vrcp.f32 %v545_v37  ;;  %v492_v7 = vmul.f32 1.442695, %v461_v63  ;;  %vm539_vm11 = vcmp.gt.f32.partialorder %v1171_v47, 20.0 }
 0x11c   :  { %v961_v55 = vpop.eup %960  ;;  %v575_v56 = vmul.f32 %v959_v52, %v1168_v42  ;;  %978 = vrcp.f32 %v553_v46  ;;  %v1214_v35 = vmul.f32 %v955_v36, %v498_v48  ;;  %vm532_vm12 = vcmp.gt.f32.partialorder %v1184_v15, 20.0 }
 0x11d   :  { %v963_v59 = vpop.eup %962  ;;  %v590_v60 = vmul.f32 %v559_v53, %v1124_v43  ;;  %v506_v62 = vadd.f32 2.0, %v961_v55  ;;  %980 = vpow2.f32 %v490_v54  ;;  %vm533_vm13 = vcmp.gt.f32.partialorder %v1201_v34, 20.0 }
 0x11e   :  { %v965_v0 = vpop.eup %964  ;;  %v598_v38 = vmul.f32 %v575_v56, %v1127_v44  ;;  %v561_v1 = vmul.f32 %v963_v59, %v1176_v58  ;;  %v546_v2 = vadd.f32 2.0, %v1214_v35  ;;  %982 = vpow2.f32 %v476_v57 }
 0x11f   :  { %v967_v42 = vpop.eup %966  ;;  %v577_v5 = vmul.f32 %v965_v0, %v1178_v61  ;;  %v1223_v6 = vmul.f32 %v961_v55, %v506_v62  ;;  %v606_v61 = vsel %vm526_vm0, %v1124_v43, %v590_v60  ;;  %vm540_vm14 = vcmp.gt.f32.partialorder %v1196_v32, 20.0 }
 0x120   :  { %v969_v8 = vpop.eup %968  ;;  %v591_v11 = vmul.f32 %v561_v1, %v1132_v49  ;;  %984 = vrcp.f32 %v546_v2  ;;  %v499_v12 = vadd.f32 2.0, %v967_v42  ;;  %v614_v17 = vsel %vm534_vm1, %v1127_v44, %v598_v38 }
 0x121   :  { %v599_v58 = vmul.f32 %v577_v5, %v1135_v50  ;;  %v554_v13 = vadd.f32 2.0, %v1223_v6  ;;  %v507_v14 = vadd.f32 2.0, %v969_v8  ;;  %986 = vpow2.f32 %v492_v7 }
 0x122   :  { %v971_v16 = vpop.eup %970  ;;  %v607_v19 = vsel %vm527_vm2, %v1132_v49, %v591_v11  ;;  %v515_v20 = vmul.f32 %v967_v42, %v499_v12  ;;  %vm541_vm15 = vcmp.gt.f32.partialorder %v1207_v41, 20.0 }
 0x123   :  { %v973_v21 = vpop.eup %972  ;;  %v774_v23 = vpack.c.bf16 %v607_v19, %v606_v61  ;;  %v615_v24 = vsel %vm535_vm3, %v1135_v50, %v599_v58  ;;  %v563_v25 = vmul.f32 %v971_v16, %v1186_v18  ;;  %988 = vrcp.f32 %v554_v13 }
 0x124   :  { %v975_v26 = vpop.eup %974  ;;  %v794_v27 = vpack.c.bf16 %v615_v24, %v614_v17  ;;  %v579_v43 = vmul.f32 %v973_v21, %v1188_v22  ;;  %v547_v31 = vadd.f32 2.0, %v515_v20  ;;  %v523_v36 = vmul.f32 %v969_v8, %v507_v14 }
 0x125   :  { %v977_v37 = vpop.eup %976  ;;  %775 = vst [vmem:[%s1308_s3] sm:$0xff] %v774_v23   ;;  %v500_v44 = vadd.f32 2.0, %v975_v26  ;;  %v592_v50 = vmul.f32 %v563_v25, %v1140_v3 }
 0x126   :  { %v979_v49 = vpop.eup %978  ;;  %814 = vst [vmem:[%s1308_s3 + $0x20] sm:$0xff] %v794_v27   ;;  %v565_v18 = vmul.f32 %v977_v37, %v1193_v30  ;;  %990 = vrcp.f32 %v547_v31  ;;  %v555_v39 = vadd.f32 2.0, %v523_v36  ;;  %v600_v45 = vmul.f32 %v579_v43, %v1143_v4 }
 0x127   :  { %v981_v22 = vpop.eup %980  ;;  %v581_v46 = vmul.f32 %v979_v49, %v1198_v33  ;;  %v516_v48 = vmul.f32 %v975_v26, %v500_v44  ;;  %v608_v57 = vsel %vm528_vm4, %v1140_v3, %v592_v50 }
 0x128   :  { %v983_v51 = vpop.eup %982  ;;  %v593_v52 = vmul.f32 %v565_v18, %v1148_v9  ;;  %992 = vrcp.f32 %v555_v39  ;;  %v508_v53 = vadd.f32 2.0, %v981_v22  ;;  %v616_v62 = vsel %vm536_vm5, %v1143_v4, %v600_v45 }
 0x129   :  { %v601_v30 = vmul.f32 %v581_v46, %v1151_v10  ;;  %v548_v54 = vadd.f32 2.0, %v516_v48  ;;  %v501_v55 = vadd.f32 2.0, %v983_v51 }
 0x12a   :  { %v985_v56 = vpop.eup %984  ;;  %v609_v59 = vsel %vm529_vm6, %v1148_v9, %v593_v52  ;;  %v524_v33 = vmul.f32 %v981_v22, %v508_v53 }
 0x12b   :  { %v987_v60 = vpop.eup %986  ;;  %v779_v63 = vpack.c.bf16 %v609_v59, %v608_v57  ;;  %v617_v0 = vsel %vm537_vm7, %v1151_v10, %v601_v30  ;;  %994 = vrcp.f32 %v548_v54  ;;  %v517_v2 = vmul.f32 %v983_v51, %v501_v55 }
 0x12c   :  { %v799_v38 = vpack.c.bf16 %v617_v0, %v616_v62  ;;  %v556_v1 = vadd.f32 2.0, %v524_v33  ;;  %v509_v42 = vadd.f32 2.0, %v987_v60  ;;  %v567_v3 = vmul.f32 %v985_v56, %v1214_v35 }
 0x12d   :  { %v989_v5 = vpop.eup %988  ;;  %811 = vst [vmem:[%s1308_s3 + $0x8] sm:$0xff] %v779_v63   ;;  %v549_v4 = vadd.f32 2.0, %v517_v2 }
 0x12e   :  { %815 = vst [vmem:[%s1308_s3 + $0x28] sm:$0xff] %v799_v38   ;;  %996 = vrcp.f32 %v556_v1  ;;  %v525_v9 = vmul.f32 %v987_v60, %v509_v42  ;;  %v583_v10 = vmul.f32 %v989_v5, %v1223_v6  ;;  %v594_v11 = vmul.f32 %v567_v3, %v1156_v28 }
 0x12f   :  { %998 = vrcp.f32 %v549_v4 }
 0x130   :  { %v991_v7 = vpop.eup %990  ;;  %v557_v8 = vadd.f32 2.0, %v525_v9  ;;  %v602_v13 = vmul.f32 %v583_v10, %v1159_v29  ;;  %v610_v6 = vsel %vm530_vm8, %v1156_v28, %v594_v11 }
 0x131   :  { %v569_v12 = vmul.f32 %v991_v7, %v515_v20 }
 0x132   :  { %v993_v58 = vpop.eup %992  ;;  %1000 = vrcp.f32 %v557_v8  ;;  %v618_v20 = vsel %vm538_vm10, %v1159_v29, %v602_v13 }
 0x133   :  { %v595_v35 = vmul.f32 %v569_v12, %v1166_v40  ;;  %v585_v14 = vmul.f32 %v993_v58, %v523_v36 }
 0x135   :  { %v995_v16 = vpop.eup %994  ;;  %v611_v61 = vsel %vm531_vm9, %v1166_v40, %v595_v35  ;;  %v603_v17 = vmul.f32 %v585_v14, %v1171_v47 }
 0x136   :  { %v784_v19 = vpack.c.bf16 %v611_v61, %v610_v6  ;;  %v571_v23 = vmul.f32 %v995_v16, %v516_v48 }
 0x137   :  { %v619_v21 = vsel %vm539_vm11, %v1171_v47, %v603_v17 }
 0x138   :  { %v997_v24 = vpop.eup %996  ;;  %812 = vst [vmem:[%s1308_s3 + $0x10] sm:$0xff] %v784_v19   ;;  %v804_v28 = vpack.c.bf16 %v619_v21, %v618_v20  ;;  %v596_v26 = vmul.f32 %v571_v23, %v1184_v15 }
 0x139   :  { %v587_v25 = vmul.f32 %v997_v24, %v524_v33  ;;  %v999_v40 = vpop.eup %998 }
 0x13a   :  { %816 = vst [vmem:[%s1308_s3 + $0x30] sm:$0xff] %v804_v28   ;;  %v573_v27 = vmul.f32 %v999_v40, %v517_v2  ;;  %v612_v36 = vsel %vm532_vm12, %v1184_v15, %v596_v26 }
 0x13b   :  { %v604_v29 = vmul.f32 %v587_v25, %v1196_v32 }
 0x13c   :  { %v1001_v43 = vpop.eup %1000  ;;  %v597_v47 = vmul.f32 %v573_v27, %v1201_v34 }
 0x13d   :  { %v589_v31 = vmul.f32 %v1001_v43, %v525_v9  ;;  %v620_v50 = vsel %vm540_vm14, %v1196_v32, %v604_v29 }
 0x13e   :  { %v613_v37 = vsel %vm533_vm13, %v1201_v34, %v597_v47 }
 0x13f   :  { %v605_v44 = vmul.f32 %v589_v31, %v1207_v41  ;;  %v789_v49 = vpack.c.bf16 %v613_v37, %v612_v36 }
 0x141   :  { %v621_v18 = vsel %vm541_vm15, %v1207_v41, %v605_v44  ;;  %813 = vst [vmem:[%s1308_s3 + $0x18] sm:$0xff] %v789_v49  }
 0x142   :  { %v809_v39 = vpack.c.bf16 %v621_v18, %v620_v50 }
 0x144   :  { %817 = vst [vmem:[%s1308_s3 + $0x38] sm:$0xff] %v809_v39  }

// kernel: dqn_forward.5
= control target key start
LH: loop header
LB: loop body
LE: loop exit
PB: predicated region body
PF: predicated region fallthrough
CT: control target
= control target key end

     0   :  { %s1200_s12 = smov 0   ;;  %s1202_s13 = smov 0   ;;  %s1320_s0 = inlined_call_operand.vmem [shape: bf16[32,2048], index: 0, kind: input, shape index: {}]   ;;  %s1321_s1 = inlined_call_operand.vmem [shape: bf16[2048,128], index: 1, kind: input, shape index: {}]   ;;  %s1322_s2 = inlined_call_operand.vmem [shape: f32[1,128], index: 2, kind: input, shape index: {}]   ;;  %s1323_s3 = inlined_call_operand.vmem [shape: bf16[32,128], index: 3, kind: output, shape index: {}]  }
   0x1   :  { %s1204_s14 = smov 0   ;;  %s1206_s15 = smov 0  }
   0x2   :  { %s1208_s16 = smov 0  }
   0x3 LB: > { %s25_s17 = sadd.s32 1, %s1173_s15  ;;  %p48_p1 = scmp.ne.s32.totalorder %s1165_s13, %s1161_s12  ;;  %s1177_s16 = sphi %s1208_s16, %s13_s16   ;;  %s1173_s15 = sphi %s1206_s15, %s1327_s15   ;;  %s1169_s14 = sphi %s1204_s14, %s1326_s14   ;;  %s1165_s13 = sphi %s1202_s13, %s1325_s13   ;;  %s1161_s12 = sphi %s1200_s12, %s1324_s12  }
   0x4   : > { %p26_p0 = scmp.ge.s32.totalorder %s25_s17, 4  ;;  %p49_p2 = scmp.eq.s32.totalorder %s1177_s16, 0 }
   0x5   : > { %s41_s19 = sadd.s32 1, %s1165_s13  ;;  %p907_p5 = scmp.ge.s32.totalorder %s1177_s16, 4 }
   0x6   : > { %s1329_s17 = smov (%p26_p0, %s25_s17), 0  ;;  %p50_p3 = por %p49_p2, %p48_p1 }
   0x7   : > { %s37_s18 = ssub.s32 %s1173_s15, %s1329_s17  ;;  %162 = sbr.rel (%p907_p5) target bundleno = 22 (0x16), region = 20 }
   0x8   : > { %p39_p4 = scmp.eq.s32.totalorder %s37_s18, 0 }
   0xa   : > { %s1235_s20 = scalar_select %p39_p4, %s1165_s13, %s41_s19  }
   0xe   : > { %165 = sbr.rel (!%p50_p3) target bundleno = 22 (0x16), region = 24  ;;  %s167_s21 = sand.u32 (%p50_p3), 1, %s1165_s13  }
   0xf   : > { %s966_s22 = sshll.u32 (%p50_p3), %s1173_s15, 4  ;;  %s908_s23 = sshll.u32 (%p50_p3), %s167_s21, 6 }
  0x10   : > { %s175_s26 = scalar_lea.vmem (%p50_p3), %s1320_s0, %s966_s22  ;;  %s169_s27 = scalar_lea.vmem (%p50_p3), [#allocation3], %s908_s23 }
  0x11   : > { %v188_v0 = vld [vmem:[%s175_s26] sm:$0xff] (%p50_p3)  ;;  %v190_v1 = vld [vmem:[%s175_s26 + $0x8] sm:$0xff] (%p50_p3) }
  0x12   : > { %v192_v2 = vld [vmem:[%s175_s26 + $0x40] sm:$0xff] (%p50_p3)  ;;  %189 = vst [vmem:[%s169_s27] sm:$0xff] (%p50_p3), %v188_v0  ;;  %191 = vst [vmem:[%s169_s27 + $0x8] sm:$0xff] (%p50_p3), %v190_v1  ;;  %v194_v3 = vld [vmem:[%s175_s26 + $0x48] sm:$0xff] (%p50_p3) }
  0x13   : > { %193 = vst [vmem:[%s169_s27 + $0x10] sm:$0xff] (%p50_p3), %v192_v2  ;;  %v196_v4 = vld [vmem:[%s175_s26 + $0x80] sm:$0xff] (%p50_p3)  ;;  %v198_v5 = vld [vmem:[%s175_s26 + $0x88] sm:$0xff] (%p50_p3)  ;;  %195 = vst [vmem:[%s169_s27 + $0x18] sm:$0xff] (%p50_p3), %v194_v3 }
  0x14   : > { %197 = vst [vmem:[%s169_s27 + $0x20] sm:$0xff] (%p50_p3), %v196_v4  ;;  %199 = vst [vmem:[%s169_s27 + $0x28] sm:$0xff] (%p50_p3), %v198_v5  ;;  %v200_v6 = vld [vmem:[%s175_s26 + $0xc0] sm:$0xff] (%p50_p3)  ;;  %v202_v7 = vld [vmem:[%s175_s26 + $0xc8] sm:$0xff] (%p50_p3) }
  0x15   : > { %201 = vst [vmem:[%s169_s27 + $0x30] sm:$0xff] %v200_v6  ;;  %203 = vst [vmem:[%s169_s27 + $0x38] sm:$0xff] %v202_v7 }
  0x16 PF: > { %p911_p6 = scmp.ge.s32.totalorder %s1177_s16, 1  ;;  %p220_p7 = scmp.lt.s32.totalorder %s1177_s16, 5 }
  0x18   : > { %p221_p8 = pnand %p911_p6, %p220_p7 }
  0x19   : > { %s227_s28 = sand.u32 (!%p221_p8), 1, %s1161_s12   ;;  %s913_s29 = sshll.u32 (!%p221_p8), %s1169_s14, 6 }
  0x1a   : > { %224 = sbr.rel (%p221_p8) target bundleno = 354 (0x162), region = 51  ;;  %s912_s30 = sshll.u32 (!%p221_p8), %s227_s28, 6 }
  0x1b   : > { %p267_p9 = scmp.lt.s32.totalorder (!%p221_p8), %s913_s29, 255  ;;  %s1252_s8 = scalar_lea.vmem (!%p221_p8), [#allocation3], %s912_s30 }
  0x1c   : > { %p915_p10 = scmp.ne.s32.totalorder (!%p221_p8), %s1169_s14, 0 }
  0x21   : > { %s1331_s29 = smov (!%p267_p9, %s913_s29), 255  ;;  %291 = sbr.rel (%p915_p10) target bundleno = 40 (0x28), region = 59 }
  0x22   : > { %s914_s4 = sshll.u32 %s1331_s29, 2  ;;  %v1179_v8 = vmov (!%p915_p10), 0.0  }
  0x23   : > { %s1250_s7 = scalar_lea.vmem %s1321_s1, %s914_s4  ;;  %292 = vst [vmem:[#allocation2] sm:$0xff] (!%p915_p10), %v1179_v8  ;;  %293 = vst [vmem:[#allocation2 + $0x8] sm:$0xff] (!%p915_p10), %v1179_v8 }
  0x24   : > { %294 = vst [vmem:[#allocation2 + $0x10] sm:$0xff] (!%p915_p10), %v1179_v8  ;;  %295 = vst [vmem:[#allocation2 + $0x18] sm:$0xff] (!%p915_p10), %v1179_v8 }
  0x28 PF: > { %v1079_v9 = vld [vmem:[%s1250_s7 + $0x40] sm:$0xff]   ;;  %v1083_v13 = vld [vmem:[%s1250_s7 + $0x48] sm:$0xff]   ;;  %v1087_v17 = vld [vmem:[%s1250_s7 + $0x50] sm:$0xff]   ;;  %p956_p11 = scmp.ne.s32.totalorder %s1169_s14, 3 }
  0x29   : > { %v1080_v10 = vld [vmem:[%s1250_s7 + $0xc0] sm:$0xff]   ;;  %982 = vmatprep.subr.bf16.mxu0 %v1079_v9  ;;  %v1084_v14 = vld [vmem:[%s1250_s7 + $0xc8] sm:$0xff]   ;;  %v1088_v18 = vld [vmem:[%s1250_s7 + $0xd0] sm:$0xff]  }
  0x2a   : > { %v1081_v11 = vld [vmem:[%s1250_s7] sm:$0xff]   ;;  %1010 = vmatprep.subr.bf16.mxu1 %v1080_v10  ;;  %v1085_v15 = vld [vmem:[%s1250_s7 + $0x8] sm:$0xff]   ;;  %v1089_v19 = vld [vmem:[%s1250_s7 + $0x10] sm:$0xff]  }
  0x2b   : > { %v1082_v12 = vld [vmem:[%s1250_s7 + $0x80] sm:$0xff]   ;;  %983 = vmatpush3.bf16.msra.mxu0 %v1081_v11  ;;  %v1086_v16 = vld [vmem:[%s1250_s7 + $0x88] sm:$0xff]   ;;  %v1090_v20 = vld [vmem:[%s1250_s7 + $0x90] sm:$0xff]  }
  0x2c   : > { %1011 = vmatpush3.bf16.msra.mxu1 %v1082_v12  ;;  %984 = vmatprep.subr.bf16.mxu0 %v1083_v13  ;;  %v1091_v21 = vld [vmem:[%s1250_s7 + $0x58] sm:$0xff]   ;;  %v1095_v25 = vld [vmem:[%s1250_s7 + $0x60] sm:$0xff]   ;;  %v1099_v29 = vld [vmem:[%s1250_s7 + $0x68] sm:$0xff]  }
  0x2d   : > { %1012 = vmatprep.subr.bf16.mxu1 %v1084_v14  ;;  %v1092_v22 = vld [vmem:[%s1250_s7 + $0xd8] sm:$0xff]   ;;  %v1096_v26 = vld [vmem:[%s1250_s7 + $0xe0] sm:$0xff]   ;;  %v1100_v30 = vld [vmem:[%s1250_s7 + $0xe8] sm:$0xff]  }
  0x2e   : > { %v1093_v23 = vld [vmem:[%s1250_s7 + $0x18] sm:$0xff]   ;;  %v1097_v27 = vld [vmem:[%s1250_s7 + $0x20] sm:$0xff]   ;;  %v1101_v31 = vld [vmem:[%s1250_s7 + $0x28] sm:$0xff]  }
  0x2f   : > { %985 = vmatpush3.bf16.msra.mxu0 %v1085_v15  ;;  %v1094_v24 = vld [vmem:[%s1250_s7 + $0x98] sm:$0xff]   ;;  %v1098_v28 = vld [vmem:[%s1250_s7 + $0xa0] sm:$0xff]   ;;  %v1102_v32 = vld [vmem:[%s1250_s7 + $0xa8] sm:$0xff]  }
  0x30   : > { %1013 = vmatpush3.bf16.msra.mxu1 %v1086_v16  ;;  %986 = vmatprep.subr.bf16.mxu0 %v1087_v17  ;;  %v1103_v33 = vld [vmem:[%s1250_s7 + $0x70] sm:$0xff]   ;;  %v1107_v37 = vld [vmem:[%s1250_s7 + $0x78] sm:$0xff]   ;;  %v296_v58 = vld [vmem:[#allocation2] sm:$0xff] }
  0x31   : > { %1014 = vmatprep.subr.bf16.mxu1 %v1088_v18  ;;  %v1104_v34 = vld [vmem:[%s1250_s7 + $0xf0] sm:$0xff]   ;;  %v1108_v38 = vld [vmem:[%s1250_s7 + $0xf8] sm:$0xff]   ;;  %v297_v63 = vld [vmem:[#allocation2 + $0x8] sm:$0xff] }
  0x32   : > { %v1105_v35 = vld [vmem:[%s1250_s7 + $0x30] sm:$0xff]   ;;  %v1109_v39 = vld [vmem:[%s1250_s7 + $0x38] sm:$0xff]  }
  0x33   : > { %987 = vmatpush3.bf16.msra.mxu0 %v1089_v19  ;;  %v1106_v36 = vld [vmem:[%s1250_s7 + $0xb0] sm:$0xff]   ;;  %v1110_v40 = vld [vmem:[%s1250_s7 + $0xb8] sm:$0xff]  }
  0x34   : > { %1015 = vmatpush3.bf16.msra.mxu1 %v1090_v20  ;;  %988 = vmatprep.subr.bf16.mxu0 %v1091_v21  ;;  %v1111_v41 = vld [vmem:[%s1252_s8] ss:$16 sps:$4 sm:$0xff]   ;;  %v1113_v42 = vld [vmem:[%s1252_s8 + $0x4] ss:$16 sps:$4 sm:$0xff]   ;;  %v1114_v43 = vld [vmem:[%s1252_s8 + $0x8] ss:$16 sps:$4 sm:$0xff]  }
  0x35   : > { %1016 = vmatprep.subr.bf16.mxu1 %v1092_v22  ;;  %v1116_v44 = vld [vmem:[%s1252_s8 + $0xc] ss:$16 sps:$4 sm:$0xff]   ;;  %636 = vmatprep.mubr.bf16.mxu0 %v1113_v42  ;;  %v1117_v45 = vld [vmem:[%s1252_s8 + $0x24] ss:$16 sps:$4 sm:$0xff]   ;;  %v1121_v47 = vld [vmem:[%s1252_s8 + $0x20] ss:$16 sps:$4 sm:$0xff]  }
  0x36   : > { %685 = vmatprep.mubr.bf16.mxu1 %v1116_v44  ;;  %v1119_v46 = vld [vmem:[%s1252_s8 + $0x2c] ss:$16 sps:$4 sm:$0xff]   ;;  %v1122_v48 = vld [vmem:[%s1252_s8 + $0x28] ss:$16 sps:$4 sm:$0xff]   ;;  %v298_v12 = vld [vmem:[#allocation2 + $0x10] sm:$0xff] }
  0x37   : > { %989 = vmatpush3.bf16.msra.mxu0 %v1093_v23  ;;  %v299_v17 = vld [vmem:[#allocation2 + $0x18] sm:$0xff]  ;;  %v957_v23 = vld [vmem:[%s1322_s2] ss:$0 sm:$0xff] (!%p956_p11) }
  0x38   : > { %1017 = vmatpush3.bf16.msra.mxu1 %v1094_v24  ;;  %990 = vmatprep.subr.bf16.mxu0 %v1095_v25 }
  0x39   : > { %1018 = vmatprep.subr.bf16.mxu1 %v1096_v26 }
  0x3b   : > { %991 = vmatpush3.bf16.msra.mxu0 %v1097_v27 }
  0x3c   : > { %1019 = vmatpush3.bf16.msra.mxu1 %v1098_v28  ;;  %992 = vmatprep.subr.bf16.mxu0 %v1099_v29 }
  0x3d   : > { %1020 = vmatprep.subr.bf16.mxu1 %v1100_v30 }
  0x3f   : > { %993 = vmatpush3.bf16.msra.mxu0 %v1101_v31 }
  0x40   : > { %1021 = vmatpush3.bf16.msra.mxu1 %v1102_v32  ;;  %994 = vmatprep.subr.bf16.mxu0 %v1103_v33 }
  0x41   : > { %1022 = vmatprep.subr.bf16.mxu1 %v1104_v34 }
  0x43   : > { %995 = vmatpush3.bf16.msra.mxu0 %v1105_v35 }
  0x44   : > { %1023 = vmatpush3.bf16.msra.mxu1 %v1106_v36  ;;  %996 = vmatprep.subr.bf16.mxu0 %v1107_v37 }
  0x45   : > { %1024 = vmatprep.subr.bf16.mxu1 %v1108_v38 }
  0x47   : > { %997 = vmatpush3.bf16.msra.mxu0 %v1109_v39 }
  0x48   : > { %1025 = vmatpush3.bf16.msra.mxu1 %v1110_v40 }
  0x4a   : > { %637 = vmatmul.mubr.bf16.vlgmr.msra.gmra.mrb[0].mxu0 %v1111_v41 }
  0x4b   : > { %686 = vmatmul.mubr.bf16.vlgmr.msra.gmra.mrb[0].mxu1 %v1114_v43  ;;  %644 = vmatprep.mubr.bf16.mxu0 %v1117_v45 }
  0x4c   : > { %693 = vmatprep.mubr.bf16.mxu1 %v1119_v46 }
  0x52   : > { %645 = vmatmul.mubr.bf16.gmra.mrb[4].mxu0 %v1121_v47 }
  0x53   : > { %694 = vmatmul.mubr.bf16.gmra.mrb[4].mxu1 %v1122_v48 }
 0x11d   : > { %v998_v49 = vpop.f32.mrb[0].mxu0 }
 0x11e   : > { %v1026_v50 = vpop.f32.mrb[0].mxu1  ;;  %v999_v51 = vpop.f32.mrb[1].mxu0 }
 0x11f   : > { %v1000_v52 = vadd.f32 %v999_v51, %v998_v49  ;;  %v1027_v53 = vpop.f32.mrb[1].mxu1  ;;  %v1001_v54 = vpop.f32.mrb[2].mxu0 }
 0x120   : > { %v1028_v55 = vadd.f32 %v1027_v53, %v1026_v50  ;;  %v1029_v56 = vpop.f32.mrb[2].mxu1  ;;  %v1002_v57 = vpop.f32.mrb[3].mxu0 }
 0x121   : > { %v1003_v59 = vadd.f32 %v1002_v57, %v1001_v54  ;;  %v1030_v60 = vpop.f32.mrb[3].mxu1 }
 0x122   : > { %v688_v61 = vadd.f32 %v1028_v55, %v1000_v52  ;;  %v1031_v62 = vadd.f32 %v1030_v60, %v1029_v56 }
 0x124   : > { %v702_v0 = vadd.f32 %v688_v61, %v296_v58  ;;  %v691_v1 = vadd.f32 %v1031_v62, %v1003_v59 }
 0x125   : > { %v1004_v2 = vpop.f32.mrb[4].mxu0 }
 0x126   : > { %706 = vst [vmem:[#allocation2] sm:$0xff] %v702_v0  ;;  %v703_v3 = vadd.f32 %v691_v1, %v297_v63  ;;  %v1032_v4 = vpop.f32.mrb[4].mxu1  ;;  %v1005_v5 = vpop.f32.mrb[5].mxu0 }
 0x127   : > { %v1006_v6 = vadd.f32 %v1005_v5, %v1004_v2  ;;  %v1033_v7 = vpop.f32.mrb[5].mxu1  ;;  %v1007_v8 = vpop.f32.mrb[6].mxu0 }
 0x128   : > { %707 = vst [vmem:[#allocation2 + $0x8] sm:$0xff] %v703_v3  ;;  %v1034_v9 = vadd.f32 %v1033_v7, %v1032_v4  ;;  %v1035_v10 = vpop.f32.mrb[6].mxu1  ;;  %v1008_v11 = vpop.f32.mrb[7].mxu0 }
 0x129   : > { %v1009_v13 = vadd.f32 %v1008_v11, %v1007_v8  ;;  %v1036_v14 = vpop.f32.mrb[7].mxu1 }
 0x12a   : > { %v696_v15 = vadd.f32 %v1034_v9, %v1006_v6  ;;  %v1037_v16 = vadd.f32 %v1036_v14, %v1035_v10  ;;  %713 = sbr.rel (%p956_p11) target bundleno = 354 (0x162), region = 63 }
 0x12c   : > { %v704_v18 = vadd.f32 %v696_v15, %v298_v12  ;;  %v699_v19 = vadd.f32 %v1037_v16, %v1009_v13 }
 0x12d   : > { %v714_v21 = vld [vmem:[#allocation2] sm:$0xff] (!%p956_p11) }
 0x12e   : > { %708 = vst [vmem:[#allocation2 + $0x10] sm:$0xff] %v704_v18  ;;  %v705_v20 = vadd.f32 %v699_v19, %v299_v17  ;;  %v725_v24 = vadd.f32 (!%p956_p11), %v957_v23, %v714_v21 }
 0x12f   : > { %v715_v22 = vld [vmem:[#allocation2 + $0x8] sm:$0xff] (!%p956_p11) }
 0x130   : > { %709 = vst [vmem:[#allocation2 + $0x18] sm:$0xff] %v705_v20  ;;  %v726_v25 = vadd.f32 (!%p956_p11), %v957_v23, %v715_v22  ;;  %v729_v30 = vmin.f32 (!%p956_p11), %v725_v24, 20.0  ;;  %vm749_vm0 = vcmp.gt.f32.partialorder (!%p956_p11), %v725_v24, 20.0 }
 0x132   : > { %v730_v31 = vmin.f32 %v726_v25, 20.0  ;;  %v733_v34 = vmul.f32 1.442695, %v729_v30  ;;  %vm750_vm1 = vcmp.gt.f32.partialorder %v726_v25, 20.0 }
 0x134   : > { %v735_v35 = vmul.f32 1.442695, %v730_v31  ;;  %1123 = vpow2.f32 %v733_v34 }
 0x135   : > { %v716_v26 = vld [vmem:[#allocation2 + $0x10] sm:$0xff] }
 0x136   : > { %v727_v28 = vadd.f32 %v957_v23, %v716_v26  ;;  %1125 = vpow2.f32 %v735_v35 }
 0x137   : > { %v717_v27 = vld [vmem:[#allocation2 + $0x18] sm:$0xff] }
 0x138   : > { %v728_v29 = vadd.f32 %v957_v23, %v717_v27  ;;  %v731_v32 = vmin.f32 %v727_v28, 20.0  ;;  %vm751_vm2 = vcmp.gt.f32.partialorder %v727_v28, 20.0 }
 0x13a   : > { %v732_v33 = vmin.f32 %v728_v29, 20.0  ;;  %v737_v36 = vmul.f32 1.442695, %v731_v32  ;;  %vm752_vm3 = vcmp.gt.f32.partialorder %v728_v29, 20.0 }
 0x13c   : > { %v739_v37 = vmul.f32 1.442695, %v732_v33  ;;  %1127 = vpow2.f32 %v737_v36 }
 0x13e   : > { %1129 = vpow2.f32 %v739_v37  ;;  %v1124_v38 = vpop.eup %1123 }
 0x13f   : > { %v741_v40 = vadd.f32 2.0, %v1124_v38 }
 0x140   : > { %v1126_v39 = vpop.eup %1125 }
 0x141   : > { %v742_v42 = vadd.f32 2.0, %v1126_v39  ;;  %v745_v44 = vmul.f32 %v1124_v38, %v741_v40 }
 0x143   : > { %v746_v46 = vmul.f32 %v1126_v39, %v742_v42  ;;  %v753_v48 = vadd.f32 2.0, %v745_v44 }
 0x145   : > { %v754_v50 = vadd.f32 2.0, %v746_v46  ;;  %1131 = vrcp.f32 %v753_v48 }
 0x146   : > { %v1128_v41 = vpop.eup %1127 }
 0x147   : > { %v743_v45 = vadd.f32 2.0, %v1128_v41  ;;  %1133 = vrcp.f32 %v754_v50 }
 0x148   : > { %v1130_v43 = vpop.eup %1129 }
 0x149   : > { %v744_v47 = vadd.f32 2.0, %v1130_v43  ;;  %v747_v49 = vmul.f32 %v1128_v41, %v743_v45 }
 0x14b   : > { %v748_v51 = vmul.f32 %v1130_v43, %v744_v47  ;;  %v755_v52 = vadd.f32 2.0, %v747_v49 }
 0x14d   : > { %v756_v53 = vadd.f32 2.0, %v748_v51  ;;  %1135 = vrcp.f32 %v755_v52 }
 0x14f   : > { %1137 = vrcp.f32 %v756_v53  ;;  %v1132_v54 = vpop.eup %1131 }
 0x150   : > { %v758_v56 = vmul.f32 %v1132_v54, %v745_v44 }
 0x151   : > { %v1134_v55 = vpop.eup %1133 }
 0x152   : > { %v760_v58 = vmul.f32 %v1134_v55, %v746_v46  ;;  %v765_v60 = vmul.f32 %v758_v56, %v725_v24 }
 0x154   : > { %v766_v62 = vmul.f32 %v760_v58, %v726_v25  ;;  %v769_v0 = vsel %vm749_vm0, %v725_v24, %v765_v60 }
 0x156   : > { %v770_v2 = vsel %vm750_vm1, %v726_v25, %v766_v62 }
 0x157   : > { %v1136_v57 = vpop.eup %1135  ;;  %v974_v4 = vpack.c.bf16 %v770_v2, %v769_v0 }
 0x158   : > { %v762_v61 = vmul.f32 %v1136_v57, %v747_v49 }
 0x159   : > { %v1138_v59 = vpop.eup %1137  ;;  %975 = vst [vmem:[%s1323_s3] sm:$0xff] %v974_v4  }
 0x15a   : > { %v764_v63 = vmul.f32 %v1138_v59, %v748_v51  ;;  %v767_v1 = vmul.f32 %v762_v61, %v727_v28 }
 0x15c   : > { %v768_v3 = vmul.f32 %v764_v63, %v728_v29  ;;  %v771_v5 = vsel %vm751_vm2, %v727_v28, %v767_v1 }
 0x15e   : > { %v772_v6 = vsel %vm752_vm3, %v728_v29, %v768_v3 }
 0x15f   : > { %v979_v7 = vpack.c.bf16 %v772_v6, %v771_v5 }
 0x161   : > { %981 = vst [vmem:[%s1323_s3 + $0x8] sm:$0xff] %v979_v7  }
 0x162 PF: > { %s13_s16 = sadd.s32 1, %s1177_s16   ;;  %s1324_s12 = smov %s1165_s13 }
 0x163   : > { %p10_p12 = scmp.ge.s32.totalorder %s13_s16, 6   ;;  %s1325_s13 = smov %s1235_s20 }
 0x164   : > { %s1326_s14 = smov %s1173_s15  ;;  %s1327_s15 = smov %s1329_s17 }
 0x165   :  { %12 = sbr.rel (!%p10_p12) target bundleno = 3 (0x3), region = 104 }

// kernel: dqn_forward.6
= control target key start
LH: loop header
LB: loop body
LE: loop exit
PB: predicated region body
PF: predicated region fallthrough
CT: control target
= control target key end

     0   :  { %s852_s12 = smov 0   ;;  %s854_s13 = smov 0   ;;  %s945_s0 = inlined_call_operand.vmem [shape: bf16[32,1152], index: 0, kind: input, shape index: {}]   ;;  %s946_s1 = inlined_call_operand.vmem [shape: bf16[1152,128], index: 1, kind: input, shape index: {}]   ;;  %s947_s2 = inlined_call_operand.vmem [shape: f32[1,128], index: 2, kind: input, shape index: {}]   ;;  %s948_s3 = inlined_call_operand.vmem [shape: bf16[32,128], index: 3, kind: output, shape index: {}]  }
   0x1   :  { %s856_s14 = smov 0   ;;  %s858_s15 = smov 0  }
   0x2   :  { %s860_s16 = smov 0  }
   0x3 LB: > { %s25_s17 = sadd.s32 1, %s825_s15  ;;  %p48_p1 = scmp.ne.s32.totalorder %s817_s13, %s813_s12  ;;  %s829_s16 = sphi %s860_s16, %s13_s16   ;;  %s825_s15 = sphi %s858_s15, %s952_s15   ;;  %s821_s14 = sphi %s856_s14, %s951_s14   ;;  %s817_s13 = sphi %s854_s13, %s950_s13   ;;  %s813_s12 = sphi %s852_s12, %s949_s12  }
   0x4   : > { %p26_p0 = scmp.ge.s32.totalorder %s25_s17, 9  ;;  %p49_p2 = scmp.eq.s32.totalorder %s829_s16, 0 }
   0x5   : > { %s41_s19 = sadd.s32 1, %s817_s13  ;;  %p651_p5 = scmp.ge.s32.totalorder %s829_s16, 9 }
   0x6   : > { %s954_s17 = smov (%p26_p0, %s25_s17), 0  ;;  %p50_p3 = por %p49_p2, %p48_p1 }
   0x7   : > { %s37_s18 = ssub.s32 %s825_s15, %s954_s17  ;;  %162 = sbr.rel (%p651_p5) target bundleno = 21 (0x15), region = 20 }
   0x8   : > { %p39_p4 = scmp.eq.s32.totalorder %s37_s18, 0 }
   0xa   : > { %s887_s20 = scalar_select %p39_p4, %s817_s13, %s41_s19  }
   0xe   : > { %165 = sbr.rel (!%p50_p3) target bundleno = 21 (0x15), region = 24  ;;  %s167_s21 = sand.u32 (%p50_p3), 1, %s817_s13  }
   0xf   : > { %s653_s22 = sshll.u32 (%p50_p3), %s825_s15, 2  ;;  %s652_s23 = sshll.u32 (%p50_p3), %s167_s21, 4 }
  0x10   : > { %s174_s26 = scalar_lea.vmem (%p50_p3), %s945_s0, %s653_s22  ;;  %s169_s27 = scalar_lea.vmem (%p50_p3), [#allocation3], %s652_s23 }
  0x11   : > { %v190_v0 = vld [vmem:[%s174_s26] sm:$0xf] (%p50_p3)  ;;  %v192_v1 = vld [vmem:[%s174_s26 + $0x24] sm:$0xf] (%p50_p3)  ;;  %v194_v2 = vld [vmem:[%s174_s26 + $0x48] sm:$0xf] (%p50_p3) }
  0x12   : > { %191 = vst [vmem:[%s169_s27] sm:$0xf] (%p50_p3), %v190_v0  ;;  %193 = vst [vmem:[%s169_s27 + $0x4] sm:$0xf] (%p50_p3), %v192_v1  ;;  %v196_v3 = vld [vmem:[%s174_s26 + $0x6c] sm:$0xf] (%p50_p3) }
  0x13   : > { %195 = vst [vmem:[%s169_s27 + $0x8] sm:$0xf] (%p50_p3), %v194_v2  ;;  %197 = vst [vmem:[%s169_s27 + $0xc] sm:$0xf] (%p50_p3), %v196_v3 }
  0x15 PF: > { %p654_p6 = scmp.ge.s32.totalorder %s829_s16, 1  ;;  %p239_p7 = scmp.lt.s32.totalorder %s829_s16, 10 }
  0x17   : > { %p240_p8 = pnand %p654_p6, %p239_p7 }
  0x18   : > { %s246_s28 = sand.u32 (!%p240_p8), 1, %s813_s12   ;;  %s656_s29 = sshll.u32 (!%p240_p8), %s821_s14, 4 }
  0x19   : > { %243 = sbr.rel (%p240_p8) target bundleno = 341 (0x155), region = 69  ;;  %s899_s30 = sshll.u32 (!%p240_p8), %s246_s28, 4 }
  0x1a   : > { %p285_p9 = scmp.lt.s32.totalorder (!%p240_p8), %s656_s29, 143  ;;  %s248_s8 = scalar_lea.vmem (!%p240_p8), [#allocation3], %s899_s30 }
  0x1b   : > { %p658_p10 = scmp.ne.s32.totalorder (!%p240_p8), %s821_s14, 0 }
  0x20   : > { %s956_s29 = smov (!%p285_p9, %s656_s29), 143  ;;  %309 = sbr.rel (%p658_p10) target bundleno = 39 (0x27), region = 77 }
  0x21   : > { %s657_s4 = sshll.u32 %s956_s29, 2  ;;  %v831_v4 = vmov (!%p658_p10), 0.0  }
  0x22   : > { %s904_s7 = scalar_lea.vmem %s946_s1, %s657_s4  ;;  %310 = vst [vmem:[#allocation2] sm:$0xff] (!%p658_p10), %v831_v4  ;;  %311 = vst [vmem:[#allocation2 + $0x8] sm:$0xff] (!%p658_p10), %v831_v4 }
  0x23   : > { %312 = vst [vmem:[#allocation2 + $0x10] sm:$0xff] (!%p658_p10), %v831_v4  ;;  %313 = vst [vmem:[#allocation2 + $0x18] sm:$0xff] (!%p658_p10), %v831_v4 }
  0x27 PF: > { %v765_v5 = vld [vmem:[%s904_s7] sm:$0xff]   ;;  %v766_v6 = vld [vmem:[%s904_s7 + $0x8] sm:$0xff]   ;;  %v767_v7 = vld [vmem:[%s904_s7 + $0x10] sm:$0xff]   ;;  %p669_p11 = scmp.ne.s32.totalorder %s821_s14, 8 }
  0x28   : > { %704 = vmatprep.subr.bf16.mxu0 %v765_v5  ;;  %v768_v8 = vld [vmem:[%s904_s7 + $0x18] sm:$0xff]   ;;  %v773_v9 = vld [vmem:[%s248_s8] sm:$0xff]   ;;  %v770_v11 = vld [vmem:[%s904_s7 + $0x28] sm:$0xff]  }
  0x29   : > { %705 = vmatpush3.bf16.msra.mxu0 %v765_v5  ;;  %720 = vmatprep.mubr.bf16.mxu0 %v773_v9  ;;  %v769_v10 = vld [vmem:[%s904_s7 + $0x20] sm:$0xff]   ;;  %v771_v12 = vld [vmem:[%s904_s7 + $0x30] sm:$0xff]   ;;  %v772_v13 = vld [vmem:[%s904_s7 + $0x38] sm:$0xff]  }
  0x2a   : > { %706 = vmatprep.subr.bf16.mxu0 %v766_v6  ;;  %v774_v14 = vld [vmem:[%s248_s8 + $0x8] sm:$0xff]   ;;  %v316_v15 = vld [vmem:[#allocation2 + $0x10] sm:$0xff]  ;;  %v314_v16 = vld [vmem:[#allocation2] sm:$0xff] }
  0x2b   : > { %v317_v18 = vld [vmem:[#allocation2 + $0x18] sm:$0xff]  ;;  %v315_v21 = vld [vmem:[#allocation2 + $0x8] sm:$0xff]  ;;  %v670_v29 = vld [vmem:[%s947_s2] ss:$0 sm:$0xff] (!%p669_p11) }
  0x2d   : > { %707 = vmatpush3.bf16.msra.mxu0 %v766_v6 }
  0x2e   : > { %708 = vmatprep.subr.bf16.mxu0 %v767_v7 }
  0x31   : > { %709 = vmatpush3.bf16.msra.mxu0 %v767_v7 }
  0x32   : > { %710 = vmatprep.subr.bf16.mxu0 %v768_v8 }
  0x35   : > { %711 = vmatpush3.bf16.msra.mxu0 %v768_v8 }
  0x36   : > { %712 = vmatprep.subr.bf16.mxu0 %v769_v10 }
  0x39   : > { %713 = vmatpush3.bf16.msra.mxu0 %v769_v10 }
  0x3a   : > { %714 = vmatprep.subr.bf16.mxu0 %v770_v11 }
  0x3d   : > { %715 = vmatpush3.bf16.msra.mxu0 %v770_v11 }
  0x3e   : > { %716 = vmatprep.subr.bf16.mxu0 %v771_v12 }
  0x41   : > { %717 = vmatpush3.bf16.msra.mxu0 %v771_v12 }
  0x42   : > { %718 = vmatprep.subr.bf16.mxu0 %v772_v13 }
  0x45   : > { %719 = vmatpush3.bf16.msra.mxu0 %v772_v13 }
  0x48   : > { %721 = vmatmul.mubr.bf16.vlgmr.msra.gmra.mrb[0].mxu0 %v774_v14 }
 0x11b   : > { %v722_v17 = vpop.f32.mrb[0].mxu0  ;;  %458 = sbr.rel (%p669_p11) target bundleno = 341 (0x155), region = 81 }
 0x11c   : > { %v449_v19 = vadd.f32 %v722_v17, %v316_v15  ;;  %v432_v20 = vpop.f32.mrb[1].mxu0 }
 0x11d   : > { %v447_v22 = vadd.f32 %v432_v20, %v314_v16  ;;  %v723_v23 = vpop.f32.mrb[2].mxu0 }
 0x11e   : > { %453 = vst [vmem:[#allocation2 + $0x10] sm:$0xff] %v449_v19  ;;  %v450_v24 = vadd.f32 %v723_v23, %v317_v18  ;;  %v435_v25 = vpop.f32.mrb[3].mxu0 }
 0x11f   : > { %451 = vst [vmem:[#allocation2] sm:$0xff] %v447_v22  ;;  %v448_v26 = vadd.f32 %v435_v25, %v315_v21 }
 0x120   : > { %454 = vst [vmem:[#allocation2 + $0x18] sm:$0xff] %v450_v24 }
 0x121   : > { %452 = vst [vmem:[#allocation2 + $0x8] sm:$0xff] %v448_v26 }
 0x125   : > { %v461_v32 = vld [vmem:[#allocation2 + $0x10] sm:$0xff] }
 0x126   : > { %v459_v27 = vld [vmem:[#allocation2] sm:$0xff]  ;;  %v472_v34 = vadd.f32 %v670_v29, %v461_v32 }
 0x127   : > { %v470_v30 = vadd.f32 %v670_v29, %v459_v27  ;;  %v462_v33 = vld [vmem:[#allocation2 + $0x18] sm:$0xff] }
 0x128   : > { %v460_v28 = vld [vmem:[#allocation2 + $0x8] sm:$0xff]  ;;  %v473_v35 = vadd.f32 %v670_v29, %v462_v33  ;;  %v476_v38 = vmin.f32 %v472_v34, 20.0  ;;  %vm496_vm2 = vcmp.gt.f32.partialorder %v472_v34, 20.0 }
 0x129   : > { %v471_v31 = vadd.f32 %v670_v29, %v460_v28  ;;  %v474_v36 = vmin.f32 %v470_v30, 20.0  ;;  %vm494_vm0 = vcmp.gt.f32.partialorder %v470_v30, 20.0 }
 0x12a   : > { %v477_v39 = vmin.f32 %v473_v35, 20.0  ;;  %v482_v42 = vmul.f32 1.442695, %v476_v38  ;;  %vm497_vm3 = vcmp.gt.f32.partialorder %v473_v35, 20.0 }
 0x12b   : > { %v475_v37 = vmin.f32 %v471_v31, 20.0  ;;  %v478_v40 = vmul.f32 1.442695, %v474_v36  ;;  %vm495_vm1 = vcmp.gt.f32.partialorder %v471_v31, 20.0 }
 0x12c   : > { %v484_v43 = vmul.f32 1.442695, %v477_v39 }
 0x12d   : > { %v480_v41 = vmul.f32 1.442695, %v475_v37  ;;  %775 = vpow2.f32 %v478_v40 }
 0x12f   : > { %777 = vpow2.f32 %v480_v41 }
 0x130   : > { %779 = vpow2.f32 %v482_v42 }
 0x131   : > { %781 = vpow2.f32 %v484_v43 }
 0x137   : > { %v776_v44 = vpop.eup %775 }
 0x138   : > { %v486_v46 = vadd.f32 2.0, %v776_v44 }
 0x139   : > { %v778_v45 = vpop.eup %777 }
 0x13a   : > { %v780_v47 = vpop.eup %779  ;;  %v487_v48 = vadd.f32 2.0, %v778_v45  ;;  %v490_v50 = vmul.f32 %v776_v44, %v486_v46 }
 0x13b   : > { %v782_v49 = vpop.eup %781  ;;  %v488_v51 = vadd.f32 2.0, %v780_v47 }
 0x13c   : > { %v491_v52 = vmul.f32 %v778_v45, %v487_v48  ;;  %v489_v53 = vadd.f32 2.0, %v782_v49  ;;  %v498_v54 = vadd.f32 2.0, %v490_v50 }
 0x13d   : > { %v492_v55 = vmul.f32 %v780_v47, %v488_v51 }
 0x13e   : > { %v499_v56 = vadd.f32 2.0, %v491_v52  ;;  %v493_v57 = vmul.f32 %v782_v49, %v489_v53  ;;  %783 = vrcp.f32 %v498_v54 }
 0x13f   : > { %v500_v58 = vadd.f32 2.0, %v492_v55 }
 0x140   : > { %785 = vrcp.f32 %v499_v56  ;;  %v501_v59 = vadd.f32 2.0, %v493_v57 }
 0x141   : > { %787 = vrcp.f32 %v500_v58 }
 0x142   : > { %789 = vrcp.f32 %v501_v59 }
 0x148   : > { %v784_v60 = vpop.eup %783 }
 0x149   : > { %v503_v62 = vmul.f32 %v784_v60, %v490_v50 }
 0x14a   : > { %v786_v61 = vpop.eup %785 }
 0x14b   : > { %v788_v63 = vpop.eup %787  ;;  %v505_v0 = vmul.f32 %v786_v61, %v491_v52  ;;  %v510_v2 = vmul.f32 %v503_v62, %v470_v30 }
 0x14c   : > { %v790_v1 = vpop.eup %789  ;;  %v507_v3 = vmul.f32 %v788_v63, %v492_v55 }
 0x14d   : > { %v511_v4 = vmul.f32 %v505_v0, %v471_v31  ;;  %v509_v5 = vmul.f32 %v790_v1, %v493_v57  ;;  %v514_v6 = vsel %vm494_vm0, %v470_v30, %v510_v2 }
 0x14e   : > { %v512_v7 = vmul.f32 %v507_v3, %v472_v34 }
 0x14f   : > { %v515_v8 = vsel %vm495_vm1, %v471_v31, %v511_v4  ;;  %v513_v9 = vmul.f32 %v509_v5, %v473_v35 }
 0x150   : > { %v686_v10 = vpack.c.bf16 %v515_v8, %v514_v6  ;;  %v516_v11 = vsel %vm496_vm2, %v472_v34, %v512_v7 }
 0x151   : > { %v517_v12 = vsel %vm497_vm3, %v473_v35, %v513_v9 }
 0x152   : > { %687 = vst [vmem:[%s948_s3] sm:$0xff] %v686_v10   ;;  %v691_v13 = vpack.c.bf16 %v517_v12, %v516_v11 }
 0x154   : > { %693 = vst [vmem:[%s948_s3 + $0x8] sm:$0xff] %v691_v13  }
 0x155 PF: > { %s13_s16 = sadd.s32 1, %s829_s16   ;;  %s949_s12 = smov %s817_s13 }
 0x156   : > { %p10_p12 = scmp.ge.s32.totalorder %s13_s16, 11   ;;  %s950_s13 = smov %s887_s20 }
 0x157   : > { %s951_s14 = smov %s825_s15  ;;  %s952_s15 = smov %s954_s17 }
 0x158   :  { %12 = sbr.rel (!%p10_p12) target bundleno = 3 (0x3), region = 122 }

// kernel: dqn_forward.7
= control target key start
LH: loop header
LB: loop body
LE: loop exit
PB: predicated region body
PF: predicated region fallthrough
CT: control target
= control target key end

     0   :  { %v956_v1 = vmov 0   ;;  %s1207_s1 = inlined_call_operand.vmem [shape: bf16[128,512], index: 1, kind: input, shape index: {}]   ;;  %s1208_s0 = inlined_call_operand.vmem [shape: bf16[32,128], index: 0, kind: input, shape index: {}]   ;;  %s1209_s3 = inlined_call_operand.vmem [shape: bf16[512,128], index: 3, kind: input, shape index: {}]   ;;  %s1210_s2 = inlined_call_operand.vmem [shape: f32[1,512], index: 2, kind: input, shape index: {}]   ;;  %s1211_s4 = inlined_call_operand.vmem [shape: f32[1,128], index: 4, kind: input, shape index: {}]   ;;  %s1212_s5 = inlined_call_operand.vmem [shape: f32[32,128], index: 5, kind: output, shape index: {}]  }
   0x1   :  { %v874_v0 = vld [vmem:[%s1207_s1 + $0x4] ss:$16 sps:$4 sm:$0xff]   ;;  %283 = vmatprep.mubr.bf16.mxu0 %v956_v1  ;;  %336 = vmatprep.mubr.bf16.mxu1 %v956_v1  ;;  %v876_v2 = vld [vmem:[%s1207_s1 + $0xc] ss:$16 sps:$4 sm:$0xff]   ;;  %v878_v3 = vld [vmem:[%s1207_s1] ss:$16 sps:$4 sm:$0xff]  }
   0x2   :  { %251 = vmatprep.subr.bf16.mxu0 %v874_v0  ;;  %v879_v4 = vld [vmem:[%s1207_s1 + $0x8] ss:$16 sps:$4 sm:$0xff]   ;;  %304 = vmatprep.subr.bf16.mxu1 %v876_v2  ;;  %v880_v5 = vld [vmem:[%s1207_s1 + $0x24] ss:$16 sps:$4 sm:$0xff]   ;;  %v882_v6 = vld [vmem:[%s1207_s1 + $0x2c] ss:$16 sps:$4 sm:$0xff]  }
   0x3   :  { %252 = vmatpush1.bf16.msra.mxu0 %v878_v3  ;;  %305 = vmatpush1.bf16.msra.mxu1 %v879_v4  ;;  %v884_v7 = vld [vmem:[%s1207_s1 + $0x20] ss:$16 sps:$4 sm:$0xff]   ;;  %v885_v8 = vld [vmem:[%s1207_s1 + $0x28] ss:$16 sps:$4 sm:$0xff]   ;;  %v886_v9 = vld [vmem:[%s1207_s1 + $0x44] ss:$16 sps:$4 sm:$0xff]   ;;  %v59_v3 = vlaneseq }
   0x4   :  { %253 = vmatprep.subr.bf16.mxu0 %v880_v5  ;;  %306 = vmatprep.subr.bf16.mxu1 %v882_v6  ;;  %v888_v10 = vld [vmem:[%s1207_s1 + $0x4c] ss:$16 sps:$4 sm:$0xff]   ;;  %v890_v11 = vld [vmem:[%s1207_s1 + $0x40] ss:$16 sps:$4 sm:$0xff]   ;;  %v891_v12 = vld [vmem:[%s1207_s1 + $0x48] ss:$16 sps:$4 sm:$0xff]  }
   0x5   :  { %v892_v13 = vld [vmem:[%s1207_s1 + $0x64] ss:$16 sps:$4 sm:$0xff]   ;;  %v894_v14 = vld [vmem:[%s1207_s1 + $0x6c] ss:$16 sps:$4 sm:$0xff]   ;;  %v896_v15 = vld [vmem:[%s1207_s1 + $0x60] ss:$16 sps:$4 sm:$0xff]  }
   0x6   :  { %v897_v16 = vld [vmem:[%s1207_s1 + $0x68] ss:$16 sps:$4 sm:$0xff]   ;;  %v898_v17 = vld [vmem:[%s1207_s1 + $0x84] ss:$16 sps:$4 sm:$0xff]   ;;  %v900_v18 = vld [vmem:[%s1207_s1 + $0x8c] ss:$16 sps:$4 sm:$0xff]  }
   0x7   :  { %254 = vmatpush1.bf16.msra.mxu0 %v884_v7  ;;  %307 = vmatpush1.bf16.msra.mxu1 %v885_v8  ;;  %v902_v19 = vld [vmem:[%s1207_s1 + $0x80] ss:$16 sps:$4 sm:$0xff]   ;;  %v903_v20 = vld [vmem:[%s1207_s1 + $0x88] ss:$16 sps:$4 sm:$0xff]   ;;  %v904_v21 = vld [vmem:[%s1207_s1 + $0xa4] ss:$16 sps:$4 sm:$0xff]  }
   0x8   :  { %255 = vmatprep.subr.bf16.mxu0 %v886_v9  ;;  %308 = vmatprep.subr.bf16.mxu1 %v888_v10  ;;  %v906_v22 = vld [vmem:[%s1207_s1 + $0xac] ss:$16 sps:$4 sm:$0xff]   ;;  %v908_v23 = vld [vmem:[%s1207_s1 + $0xa0] ss:$16 sps:$4 sm:$0xff]   ;;  %v909_v24 = vld [vmem:[%s1207_s1 + $0xa8] ss:$16 sps:$4 sm:$0xff]  }
   0x9   :  { %v910_v25 = vld [vmem:[%s1207_s1 + $0xc4] ss:$16 sps:$4 sm:$0xff]   ;;  %v912_v26 = vld [vmem:[%s1207_s1 + $0xcc] ss:$16 sps:$4 sm:$0xff]   ;;  %v914_v27 = vld [vmem:[%s1207_s1 + $0xc0] ss:$16 sps:$4 sm:$0xff]  }
   0xa   :  { %v915_v28 = vld [vmem:[%s1207_s1 + $0xc8] ss:$16 sps:$4 sm:$0xff]   ;;  %v916_v29 = vld [vmem:[%s1207_s1 + $0xe4] ss:$16 sps:$4 sm:$0xff]   ;;  %v918_v30 = vld [vmem:[%s1207_s1 + $0xec] ss:$16 sps:$4 sm:$0xff]  }
   0xb   :  { %256 = vmatpush1.bf16.msra.mxu0 %v890_v11  ;;  %309 = vmatpush1.bf16.msra.mxu1 %v891_v12  ;;  %v920_v31 = vld [vmem:[%s1207_s1 + $0xe0] ss:$16 sps:$4 sm:$0xff]   ;;  %v921_v32 = vld [vmem:[%s1207_s1 + $0xe8] ss:$16 sps:$4 sm:$0xff]   ;;  %v60_v4 = vshrl.u32 %v59_v3, 7 }
   0xc   :  { %257 = vmatprep.subr.bf16.mxu0 %v892_v13  ;;  %310 = vmatprep.subr.bf16.mxu1 %v894_v14  ;;  %v924_v33 = vld [vmem:[%s1209_s3 + $0x40] sm:$0xff]   ;;  %v928_v38 = vld [vmem:[%s1209_s3 + $0x48] sm:$0xff]   ;;  %v932_v43 = vld [vmem:[%s1209_s3 + $0x50] sm:$0xff]  }
   0xd   :  { %v925_v34 = vld [vmem:[%s1209_s3 + $0xc0] sm:$0xff]   ;;  %v929_v39 = vld [vmem:[%s1209_s3 + $0xc8] sm:$0xff]   ;;  %v933_v44 = vld [vmem:[%s1209_s3 + $0xd0] sm:$0xff]   ;;  %v61_v5 = vsub.s32 0, %v60_v4  ;;  %v69_v6 = vsub.s32 2, %v60_v4  ;;  %v65_v8 = vsub.s32 1, %v60_v4 }
   0xe   :  { %v922_v35 = vld [vmem:[%s1208_s0] sm:$0xff]   ;;  %v930_v40 = vld [vmem:[%s1209_s3 + $0x8] sm:$0xff]   ;;  %v934_v45 = vld [vmem:[%s1209_s3 + $0x10] sm:$0xff]   ;;  %v73_v9 = vsub.s32 3, %v60_v4 }
   0xf   :  { %258 = vmatpush1.bf16.msra.mxu0 %v896_v15  ;;  %311 = vmatpush1.bf16.msra.mxu1 %v897_v16  ;;  %v926_v36 = vld [vmem:[%s1209_s3] sm:$0xff]   ;;  %v931_v41 = vld [vmem:[%s1209_s3 + $0x88] sm:$0xff]   ;;  %v935_v46 = vld [vmem:[%s1209_s3 + $0x90] sm:$0xff]  }
  0x10   :  { %259 = vmatprep.subr.bf16.mxu0 %v898_v17  ;;  %312 = vmatprep.subr.bf16.mxu1 %v900_v18  ;;  %v927_v37 = vld [vmem:[%s1209_s3 + $0x80] sm:$0xff]   ;;  %v923_v42 = vld [vmem:[%s1208_s0 + $0x8] sm:$0xff]   ;;  %v936_v47 = vld [vmem:[%s1209_s3 + $0x58] sm:$0xff]  }
  0x11   :  { %v937_v48 = vld [vmem:[%s1209_s3 + $0xd8] sm:$0xff]   ;;  %v940_v51 = vld [vmem:[%s1209_s3 + $0x60] sm:$0xff]   ;;  %v944_v55 = vld [vmem:[%s1209_s3 + $0x68] sm:$0xff]  }
  0x12   :  { %v938_v49 = vld [vmem:[%s1209_s3 + $0x18] sm:$0xff]   ;;  %v941_v52 = vld [vmem:[%s1209_s3 + $0xe0] sm:$0xff]   ;;  %v945_v56 = vld [vmem:[%s1209_s3 + $0xe8] sm:$0xff]  }
  0x13   :  { %260 = vmatpush1.bf16.msra.mxu0 %v902_v19  ;;  %313 = vmatpush1.bf16.msra.mxu1 %v903_v20  ;;  %v939_v50 = vld [vmem:[%s1209_s3 + $0x98] sm:$0xff]   ;;  %v942_v53 = vld [vmem:[%s1209_s3 + $0x20] sm:$0xff]   ;;  %v946_v57 = vld [vmem:[%s1209_s3 + $0x28] sm:$0xff]  }
  0x14   :  { %261 = vmatprep.subr.bf16.mxu0 %v904_v21  ;;  %314 = vmatprep.subr.bf16.mxu1 %v906_v22  ;;  %v943_v54 = vld [vmem:[%s1209_s3 + $0xa0] sm:$0xff]   ;;  %v947_v58 = vld [vmem:[%s1209_s3 + $0xa8] sm:$0xff]   ;;  %v948_v59 = vld [vmem:[%s1209_s3 + $0x70] sm:$0xff]  }
  0x15   :  { %v949_v60 = vld [vmem:[%s1209_s3 + $0xf0] sm:$0xff]   ;;  %v952_v63 = vld [vmem:[%s1209_s3 + $0x78] sm:$0xff]   ;;  %v57_v7 = vld [vmem:[%s1210_s2] sm:$0xf] }
  0x16   :  { %v950_v61 = vld [vmem:[%s1209_s3 + $0x30] sm:$0xff]   ;;  %v953_v0 = vld [vmem:[%s1209_s3 + $0xf8] sm:$0xff]   ;;  %v62_v10 = vrot.slane %v57_v7, %v61_v5  ;;  %v70_v11 = vrot.slane %v57_v7, %v69_v6  ;;  %v66_v12 = vrot.slane %v57_v7, %v65_v8  ;;  %v74_v13 = vrot.slane %v57_v7, %v73_v9  ;;  %v784_v8 = vld [vmem:[%s1211_s4] ss:$0 sm:$0xff] }
  0x17   :  { %262 = vmatpush1.bf16.msra.mxu0 %v908_v23  ;;  %315 = vmatpush1.bf16.msra.mxu1 %v909_v24  ;;  %v951_v62 = vld [vmem:[%s1209_s3 + $0xb0] sm:$0xff]   ;;  %v955_v2 = vld [vmem:[%s1209_s3 + $0xb8] sm:$0xff]  }
  0x18   :  { %263 = vmatprep.subr.bf16.mxu0 %v910_v25  ;;  %316 = vmatprep.subr.bf16.mxu1 %v912_v26 }
  0x1b   :  { %264 = vmatpush1.bf16.msra.mxu0 %v914_v27  ;;  %317 = vmatpush1.bf16.msra.mxu1 %v915_v28 }
  0x1c   :  { %265 = vmatprep.subr.bf16.mxu0 %v916_v29  ;;  %318 = vmatprep.subr.bf16.mxu1 %v918_v30 }
  0x1f   :  { %266 = vmatpush1.bf16.msra.mxu0 %v920_v31  ;;  %319 = vmatpush1.bf16.msra.mxu1 %v921_v32 }
  0x20   :  { %817 = vmatprep.subr.bf16.mxu0 %v924_v33  ;;  %845 = vmatprep.subr.bf16.mxu1 %v925_v34 }
  0x22   :  { %284 = vmatmul.mubr.bf16.vlgmr.msra.gmra.mrb[0].mxu0 %v922_v35  ;;  %337 = vmatmul.mubr.bf16.vlgmr.msra.gmra.mrb[0].mxu1 %v922_v35 }
  0x23   :  { %293 = vmatprep.mubr.bf16.mxu0 %v956_v1  ;;  %346 = vmatprep.mubr.bf16.mxu1 %v956_v1  ;;  %v954_v1 = vld [vmem:[%s1209_s3 + $0x38] sm:$0xff]  }
  0x24   :  { %818 = vmatpush3.bf16.msra.mxu0 %v926_v36  ;;  %846 = vmatpush3.bf16.msra.mxu1 %v927_v37 }
  0x25   :  { %819 = vmatprep.subr.bf16.mxu0 %v928_v38  ;;  %847 = vmatprep.subr.bf16.mxu1 %v929_v39 }
  0x28   :  { %820 = vmatpush3.bf16.msra.mxu0 %v930_v40  ;;  %848 = vmatpush3.bf16.msra.mxu1 %v931_v41 }
  0x29   :  { %821 = vmatprep.subr.bf16.mxu0 %v932_v43  ;;  %849 = vmatprep.subr.bf16.mxu1 %v933_v44 }
  0x2a   :  { %294 = vmatmul.mubr.bf16.gmra.mrb[4].mxu0 %v923_v42  ;;  %347 = vmatmul.mubr.bf16.gmra.mrb[4].mxu1 %v923_v42 }
  0x2c   :  { %822 = vmatpush3.bf16.msra.mxu0 %v934_v45  ;;  %850 = vmatpush3.bf16.msra.mxu1 %v935_v46 }
  0x2d   :  { %823 = vmatprep.subr.bf16.mxu0 %v936_v47  ;;  %851 = vmatprep.subr.bf16.mxu1 %v937_v48 }
  0x30   :  { %824 = vmatpush3.bf16.msra.mxu0 %v938_v49  ;;  %852 = vmatpush3.bf16.msra.mxu1 %v939_v50 }
  0x31   :  { %825 = vmatprep.subr.bf16.mxu0 %v940_v51  ;;  %853 = vmatprep.subr.bf16.mxu1 %v941_v52 }
  0x34   :  { %826 = vmatpush3.bf16.msra.mxu0 %v942_v53  ;;  %854 = vmatpush3.bf16.msra.mxu1 %v943_v54 }
  0x35   :  { %827 = vmatprep.subr.bf16.mxu0 %v944_v55  ;;  %855 = vmatprep.subr.bf16.mxu1 %v945_v56 }
  0x38   :  { %828 = vmatpush3.bf16.msra.mxu0 %v946_v57  ;;  %856 = vmatpush3.bf16.msra.mxu1 %v947_v58 }
  0x39   :  { %829 = vmatprep.subr.bf16.mxu0 %v948_v59  ;;  %857 = vmatprep.subr.bf16.mxu1 %v949_v60 }
  0x3c   :  { %830 = vmatpush3.bf16.msra.mxu0 %v950_v61  ;;  %858 = vmatpush3.bf16.msra.mxu1 %v951_v62 }
  0x3d   :  { %831 = vmatprep.subr.bf16.mxu0 %v952_v63  ;;  %859 = vmatprep.subr.bf16.mxu1 %v953_v0 }
  0x40   :  { %832 = vmatpush3.bf16.msra.mxu0 %v954_v1  ;;  %860 = vmatpush3.bf16.msra.mxu1 %v955_v2 }
  0xf5   :  { %v285_v14 = vpop.f32.mrb[0].mxu0  ;;  %v338_v15 = vpop.f32.mrb[0].mxu1 }
  0xf6   :  { %v286_v16 = vadd.f32 %v285_v14, %v62_v10  ;;  %v339_v17 = vadd.f32 %v338_v15, %v70_v11  ;;  %v287_v18 = vpop.f32.mrb[1].mxu0  ;;  %v340_v19 = vpop.f32.mrb[1].mxu1 }
  0xf7   :  { %v288_v20 = vadd.f32 %v287_v18, %v66_v12  ;;  %v341_v21 = vadd.f32 %v340_v19, %v74_v13  ;;  %v289_v22 = vpop.f32.mrb[2].mxu0  ;;  %v342_v23 = vpop.f32.mrb[2].mxu1 }
  0xf8   :  { %v359_v24 = vmax.f32 %v339_v17, 0.0  ;;  %v290_v25 = vadd.f32 %v289_v22, %v62_v10  ;;  %v343_v26 = vadd.f32 %v342_v23, %v70_v11  ;;  %v291_v27 = vpop.f32.mrb[3].mxu0  ;;  %v344_v28 = vpop.f32.mrb[3].mxu1  ;;  %v357_v32 = vmax.f32 %v286_v16, 0.0 }
  0xf9   :  { %v360_v29 = vmax.f32 %v341_v21, 0.0  ;;  %v292_v30 = vadd.f32 %v291_v27, %v66_v12  ;;  %v345_v31 = vadd.f32 %v344_v28, %v74_v13  ;;  %v358_v35 = vmax.f32 %v288_v20, 0.0 }
  0xfa   :  { %v361_v33 = vmax.f32 %v290_v25, 0.0  ;;  %v363_v34 = vmax.f32 %v343_v26, 0.0 }
  0xfb   :  { %v362_v36 = vmax.f32 %v292_v30, 0.0  ;;  %v364_v37 = vmax.f32 %v345_v31, 0.0 }
  0xfc   :  { %v373_v38 = vpack.c.bf16 %v361_v33, %v357_v32  ;;  %v375_v39 = vpack.c.bf16 %v363_v34, %v359_v24 }
  0xfd   :  { %v374_v40 = vpack.c.bf16 %v362_v36, %v358_v35  ;;  %v376_v41 = vpack.c.bf16 %v364_v37, %v360_v29  ;;  %v295_v42 = vpop.f32.mrb[4].mxu0  ;;  %v348_v43 = vpop.f32.mrb[4].mxu1 }
  0xfe   :  { %v296_v44 = vadd.f32 %v295_v42, %v62_v10  ;;  %v349_v45 = vadd.f32 %v348_v43, %v70_v11  ;;  %v297_v46 = vpop.f32.mrb[5].mxu0  ;;  %v350_v47 = vpop.f32.mrb[5].mxu1 }
  0xff   :  { %v298_v48 = vadd.f32 %v297_v46, %v66_v12  ;;  %v351_v49 = vadd.f32 %v350_v47, %v74_v13  ;;  %v299_v50 = vpop.f32.mrb[6].mxu0  ;;  %v352_v51 = vpop.f32.mrb[6].mxu1  ;;  %676 = vmatprep.mubr.bf16.mxu0 %v374_v40  ;;  %725 = vmatprep.mubr.bf16.mxu1 %v376_v41 }
 0x100   :  { %v367_v52 = vmax.f32 %v349_v45, 0.0  ;;  %v300_v53 = vadd.f32 %v299_v50, %v62_v10  ;;  %v353_v54 = vadd.f32 %v352_v51, %v70_v11  ;;  %v301_v55 = vpop.f32.mrb[7].mxu0  ;;  %v354_v56 = vpop.f32.mrb[7].mxu1  ;;  %677 = vmatmul.mubr.bf16.vlgmr.msra.gmra.mrb[8].mxu0 %v373_v38  ;;  %726 = vmatmul.mubr.bf16.vlgmr.msra.gmra.mrb[8].mxu1 %v375_v39  ;;  %v365_v60 = vmax.f32 %v296_v44, 0.0 }
 0x101   :  { %v368_v57 = vmax.f32 %v351_v49, 0.0  ;;  %v302_v58 = vadd.f32 %v301_v55, %v66_v12  ;;  %v355_v59 = vadd.f32 %v354_v56, %v74_v13  ;;  %v366_v63 = vmax.f32 %v298_v48, 0.0 }
 0x102   :  { %v369_v61 = vmax.f32 %v300_v53, 0.0  ;;  %v371_v62 = vmax.f32 %v353_v54, 0.0 }
 0x103   :  { %v370_v0 = vmax.f32 %v302_v58, 0.0  ;;  %v372_v1 = vmax.f32 %v355_v59, 0.0 }
 0x104   :  { %v377_v2 = vpack.c.bf16 %v369_v61, %v365_v60  ;;  %v379_v3 = vpack.c.bf16 %v371_v62, %v367_v52 }
 0x105   :  { %v378_v4 = vpack.c.bf16 %v370_v0, %v366_v63  ;;  %v380_v5 = vpack.c.bf16 %v372_v1, %v368_v57 }
 0x107   :  { %684 = vmatprep.mubr.bf16.mxu0 %v378_v4  ;;  %733 = vmatprep.mubr.bf16.mxu1 %v380_v5 }
 0x108   :  { %685 = vmatmul.mubr.bf16.gmra.mrb[12].mxu0 %v377_v2  ;;  %734 = vmatmul.mubr.bf16.gmra.mrb[12].mxu1 %v379_v3 }
 0x1d3   :  { %v833_v6 = vpop.f32.mrb[8].mxu0  ;;  %v861_v7 = vpop.f32.mrb[8].mxu1 }
 0x1d4   :  { %v834_v9 = vpop.f32.mrb[9].mxu0  ;;  %v862_v10 = vpop.f32.mrb[9].mxu1 }
 0x1d5   :  { %v835_v11 = vadd.f32 %v834_v9, %v833_v6  ;;  %v863_v12 = vadd.f32 %v862_v10, %v861_v7  ;;  %v836_v13 = vpop.f32.mrb[10].mxu0  ;;  %v864_v14 = vpop.f32.mrb[10].mxu1 }
 0x1d6   :  { %v837_v15 = vpop.f32.mrb[11].mxu0  ;;  %v865_v16 = vpop.f32.mrb[11].mxu1 }
 0x1d7   :  { %v679_v17 = vadd.f32 %v835_v11, %v784_v8  ;;  %v838_v18 = vadd.f32 %v837_v15, %v836_v13  ;;  %v866_v19 = vadd.f32 %v865_v16, %v864_v14 }
 0x1d9   :  { %v728_v20 = vadd.f32 %v863_v12, %v679_v17  ;;  %v682_v21 = vadd.f32 %v838_v18, %v784_v8 }
 0x1db   :  { %742 = vst [vmem:[%s1212_s5] sm:$0xff] %v728_v20  ;;  %v731_v22 = vadd.f32 %v866_v19, %v682_v21  ;;  %v839_v23 = vpop.f32.mrb[12].mxu0  ;;  %v867_v24 = vpop.f32.mrb[12].mxu1 }
 0x1dc   :  { %v840_v25 = vpop.f32.mrb[13].mxu0  ;;  %v868_v26 = vpop.f32.mrb[13].mxu1 }
 0x1dd   :  { %743 = vst [vmem:[%s1212_s5 + $0x8] sm:$0xff] %v731_v22  ;;  %v841_v27 = vadd.f32 %v840_v25, %v839_v23  ;;  %v869_v28 = vadd.f32 %v868_v26, %v867_v24  ;;  %v842_v29 = vpop.f32.mrb[14].mxu0  ;;  %v870_v30 = vpop.f32.mrb[14].mxu1 }
 0x1de   :  { %v843_v31 = vpop.f32.mrb[15].mxu0  ;;  %v871_v32 = vpop.f32.mrb[15].mxu1 }
 0x1df   :  { %v687_v33 = vadd.f32 %v841_v27, %v784_v8  ;;  %v844_v34 = vadd.f32 %v843_v31, %v842_v29  ;;  %v872_v35 = vadd.f32 %v871_v32, %v870_v30 }
 0x1e1   :  { %v736_v36 = vadd.f32 %v869_v28, %v687_v33  ;;  %v690_v37 = vadd.f32 %v844_v34, %v784_v8 }
 0x1e3   :  { %744 = vst [vmem:[%s1212_s5 + $0x10] sm:$0xff] %v736_v36  ;;  %v739_v38 = vadd.f32 %v872_v35, %v690_v37 }
 0x1e5   :  { %745 = vst [vmem:[%s1212_s5 + $0x18] sm:$0xff] %v739_v38 }

</bundles_post_ra>
